<compile_context>
chip_gen: v7x
topology: tpu7x:2x2x1
jax: 0.10.0
libtpu: 0.0.40
codegen_flags: <defaults>
</compile_context>

<pallas_src>
import functools

import numpy as np
import jax
import jax.numpy as jnp
from jax import lax
from jax.experimental import pallas as pl
from jax.experimental.pallas import tpu as pltpu


def _round_up(x, m):
    return ((x + m - 1) // m) * m


def _plan_m_tiling(M):
    """Return (M_pad, tm): tm divides M_pad, prefers >=2 grid steps (v7x
    megacore) and tiles of at most 1024 rows (VMEM / pipelining sweet spot)."""
    if M <= 128:
        return M, M                     # single full-array block
    M_pad = _round_up(M, 128)
    for t in (1024, 512, 256, 128):
        if M_pad % t == 0 and M_pad // t >= 2:
            return M_pad, t
    return M_pad, 128


def _pick_tile_b(B):
    if B <= 128:
        return B
    for t in (256, 128):
        if B % t == 0 and B // t >= 2:
            return t
    return B  # TODO(synk): pad ragged large batch sizes to a multiple of 128


# ----------------------------------------------------------------------------
# Conv layer: folded-K GEMM (taps folded into the contraction), bf16 operands,
# f32 accumulation, fused bias + ReLU, M-tiled "parallel" grid.
# ----------------------------------------------------------------------------
def _gemm_bias_relu_kernel(p_ref, w_ref, b_ref, o_ref):
    acc = jnp.dot(p_ref[...], w_ref[...], preferred_element_type=jnp.float32)
    o_ref[...] = jnp.maximum(acc + b_ref[...], 0.0).astype(o_ref.dtype)


def conv2d_relu(x_nhwc, w_slab, b, ksize, stride, out_dtype=jnp.float32):
    """x_nhwc: (N,H,W,Cin) bf16; w_slab: (Cin*KK, Cout) bf16, rows ordered
    channel-major (cin*KK + tap); b: (1, Cout) f32."""
    N, H, W, Cin = x_nhwc.shape
    K, Cout = w_slab.shape
    OH = (H - ksize) // stride + 1
    OW = (W - ksize) // stride + 1

    # One fused XLA op builds the im2col patches; output feature ordering is
    # channel-major (cin * KK + tap), matching w_slab's row ordering.
    patches = lax.conv_general_dilated_patches(
        x_nhwc, (ksize, ksize), (stride, stride), "VALID",
        dimension_numbers=("NHWC", "HWIO", "NHWC"))
    M = N * OH * OW
    patches = patches.reshape(M, K)

    M_pad, tm = _plan_m_tiling(M)
    if M_pad != M:
        patches = jnp.pad(patches, ((0, M_pad - M), (0, 0)))

    out = pl.pallas_call(
        _gemm_bias_relu_kernel,
        out_shape=jax.ShapeDtypeStruct((M_pad, Cout), out_dtype),
        grid_spec=pltpu.PrefetchScalarGridSpec(
            num_scalar_prefetch=0,
            grid=(M_pad // tm,),
            in_specs=[
                pl.BlockSpec((tm, K), lambda i: (i, 0)),
                pl.BlockSpec((K, Cout), lambda i: (0, 0)),
                pl.BlockSpec((1, Cout), lambda i: (0, 0)),
            ],
            out_specs=pl.BlockSpec((tm, Cout), lambda i: (i, 0)),
        ),
        compiler_params=pltpu.CompilerParams(
            dimension_semantics=("parallel",),
            vmem_limit_bytes=32 * 1024 * 1024),
        cost_estimate=pl.CostEstimate(
            flops=2 * M_pad * K * Cout,
            transcendentals=0,
            bytes_accessed=(2 * M_pad * K + 2 * K * Cout + 4 * Cout
                            + jnp.dtype(out_dtype).itemsize * M_pad * Cout)),
    )(patches, w_slab, b)

    if M_pad != M:
        out = out[:M]
    return out.reshape(N, OH, OW, Cout)


# ----------------------------------------------------------------------------
# Head kernel 1 (B-tiled, "arbitrary"): deconv recon + running global max of
# |conv_out - recon| accumulated across grid steps in a (1,1) VMEM scratch.
# ----------------------------------------------------------------------------
def _recon_max_kernel(logic_ref, conv_ref, dw1, db1, dw2, db2,
                      recon_ref, max_ref, m_acc):
    i = pl.program_id(0)
    h = (jnp.dot(logic_ref[...], dw1[...], preferred_element_type=jnp.float32)
         + db1[...])
    recon = (jnp.dot(h, dw2[...], preferred_element_type=jnp.float32)
             + db2[...])
    recon_ref[...] = recon

    diff = jnp.abs(conv_ref[...] - recon)
    row_max = jnp.max(diff, axis=1, keepdims=True)     # lane reduce
    tmax = jnp.max(row_max, axis=0, keepdims=True)     # sublane reduce -> (1,1)

    @pl.when(i == 0)
    def _():
        m_acc[...] = tmax

    @pl.when(i > 0)
    def _():
        m_acc[...] = jnp.maximum(m_acc[...], tmax)

    @pl.when(i == pl.num_programs(0) - 1)
    def _():
        max_ref[...] = m_acc[...]


# ----------------------------------------------------------------------------
# Head kernel 2 (B-tiled, "parallel"): matching gate + masked fc MLP + fc2.
# Weights are VMEM-resident via constant index maps; big dots use bf16 operands.
# ----------------------------------------------------------------------------
def _gated_fc_kernel(conv_ref, recon_ref, logic_ref, max_ref,
                     fw1, fb1, fw2, fb2, qwa, qwb, qb, q_ref):
    conv_out = conv_ref[...]
    diff = jnp.abs(conv_out - recon_ref[...])
    inv = pl.reciprocal(max_ref[...], approx=False)    # (1,1); NaN if max==0,
    masked = conv_out * diff * inv                     # matching torch diff/max

    h1 = jnp.maximum(
        jnp.dot(masked.astype(jnp.bfloat16), fw1[...],
                preferred_element_type=jnp.float32) + fb1[...], 0.0)
    fc_out = jnp.maximum(
        jnp.dot(h1.astype(jnp.bfloat16), fw2[...],
                preferred_element_type=jnp.float32) + fb2[...], 0.0)

    # fc2 over concat(fc_out, logic) expressed as split weights (no lane concat).
    # These dots have K=12 / K=fsa_dim — kept f32 (no bandwidth to save, and it
    # preserves q precision).
    q = (jnp.dot(fc_out, qwa[...], preferred_element_type=jnp.float32)
         + jnp.dot(logic_ref[...], qwb[...], preferred_element_type=jnp.float32)
         + qb[...])
    q_ref[...] = q


def heads(conv_out, logic, kp, n_actions):
    B, conv_out_size = conv_out.shape
    fsa_dim = logic.shape[1]
    P = kp["fw1_p"].shape[0]
    QP = kp["qb_p"].shape[1]
    two_a = 2 * n_actions

    # Only data-dependent padding left per call (weights pre-padded at init).
    conv_pad = jnp.pad(conv_out, ((0, 0), (0, P - conv_out_size)))

    bt = _pick_tile_b(B)
    nb = B // bt

    # ---- pass 1: recon + global max ---------------------------------------
    h1_flops = 2 * B * (fsa_dim * 32 + 32 * P) + 4 * B * P
    h1_bytes = 4 * (B * fsa_dim + 2 * B * P + fsa_dim * 32 + 32 + 32 * P + P + 1)
    recon_pad, max_diff = pl.pallas_call(
        _recon_max_kernel,
        out_shape=(jax.ShapeDtypeStruct((B, P), jnp.float32),
                   jax.ShapeDtypeStruct((1, 1), jnp.float32)),
        grid_spec=pltpu.PrefetchScalarGridSpec(
            num_scalar_prefetch=0,
            grid=(nb,),
            in_specs=[
                pl.BlockSpec((bt, fsa_dim), lambda i: (i, 0)),
                pl.BlockSpec((bt, P), lambda i: (i, 0)),
                pl.BlockSpec(kp["dw1"].shape, lambda i: (0, 0)),
                pl.BlockSpec(kp["db1"].shape, lambda i: (0, 0)),
                pl.BlockSpec(kp["dw2_p"].shape, lambda i: (0, 0)),
                pl.BlockSpec(kp["db2_p"].shape, lambda i: (0, 0)),
            ],
            out_specs=(pl.BlockSpec((bt, P), lambda i: (i, 0)),
                       pl.BlockSpec((1, 1), lambda i: (0, 0))),
            scratch_shapes=[pltpu.VMEM((1, 1), jnp.float32)],
        ),
        compiler_params=pltpu.CompilerParams(
            dimension_semantics=("arbitrary",)),   # running-max accumulator
        cost_estimate=pl.CostEstimate(flops=h1_flops, transcendentals=0,
                                      bytes_accessed=h1_bytes),
    )(logic, conv_pad, kp["dw1"], kp["db1"], kp["dw2_p"], kp["db2_p"])

    # ---- pass 2: gate + fc MLP + fc2 ---------------------------------------
    h2_flops = (2 * B * (P * 512 + 512 * two_a + two_a * QP + fsa_dim * QP)
                + 6 * B * P)
    h2_bytes = (4 * (2 * B * P + B * fsa_dim + 1 + B * QP)
                + 2 * (P * 512 + 512 * two_a)
                + 4 * (512 + two_a + two_a * QP + fsa_dim * QP + QP))
    q_pad = pl.pallas_call(
        _gated_fc_kernel,
        out_shape=jax.ShapeDtypeStruct((B, QP), jnp.float32),
        grid_spec=pltpu.PrefetchScalarGridSpec(
            num_scalar_prefetch=0,
            grid=(nb,),
            in_specs=[
                pl.BlockSpec((bt, P), lambda i: (i, 0)),        # conv_pad
                pl.BlockSpec((bt, P), lambda i: (i, 0)),        # recon_pad
                pl.BlockSpec((bt, fsa_dim), lambda i: (i, 0)),  # logic
                pl.BlockSpec((1, 1), lambda i: (0, 0)),         # global max
                pl.BlockSpec(kp["fw1_p"].shape, lambda i: (0, 0)),
                pl.BlockSpec(kp["fb1"].shape, lambda i: (0, 0)),
                pl.BlockSpec(kp["fw2"].shape, lambda i: (0, 0)),
                pl.BlockSpec(kp["fb2"].shape, lambda i: (0, 0)),
                pl.BlockSpec(kp["qwa_p"].shape, lambda i: (0, 0)),
                pl.BlockSpec(kp["qwb_p"].shape, lambda i: (0, 0)),
                pl.BlockSpec(kp["qb_p"].shape, lambda i: (0, 0)),
            ],
            out_specs=pl.BlockSpec((bt, QP), lambda i: (i, 0)),
        ),
        compiler_params=pltpu.CompilerParams(
            dimension_semantics=("parallel",)),
        cost_estimate=pl.CostEstimate(flops=h2_flops, transcendentals=0,
                                      bytes_accessed=h2_bytes),
    )(conv_pad, recon_pad, logic, max_diff,
      kp["fw1_p"], kp["fb1"], kp["fw2"], kp["fb2"],
      kp["qwa_p"], kp["qwb_p"], kp["qb_p"])

    return q_pad[:, :n_actions], recon_pad[:, :conv_out_size]


# ----------------------------------------------------------------------------
# Parameter init (deterministic, synthetic, torch-equivalent layout) and the
# one-time kernel-ready preparation (reorder / pad / split / bf16-cast).
# ----------------------------------------------------------------------------
def _uniform(key, shape, bound):
    return jax.random.uniform(key, shape, jnp.float32, -bound, bound)


def conv_out_size_fn(H, W):
    o = lambda h, k, s: (h - k) // s + 1
    h = o(o(o(H, 8, 4), 4, 2), 3, 1)
    w = o(o(o(W, 8, 4), 4, 2), 3, 1)
    return 64 * h * w


def init_params(key, in_ch, fsa_dim, n_actions, conv_out_size):
    ks = jax.random.split(key, 16)
    p = {}
    b1 = 1.0 / np.sqrt(in_ch * 8 * 8)
    p["cw1"] = _uniform(ks[0], (64, in_ch, 32), b1)          # (KK, Cin, Cout)
    p["cb1"] = _uniform(ks[1], (1, 32), b1)
    b2 = 1.0 / np.sqrt(32 * 4 * 4)
    p["cw2"] = _uniform(ks[2], (16, 32, 64), b2)
    p["cb2"] = _uniform(ks[3], (1, 64), b2)
    b3 = 1.0 / np.sqrt(64 * 3 * 3)
    p["cw3"] = _uniform(ks[4], (9, 64, 64), b3)
    p["cb3"] = _uniform(ks[5], (1, 64), b3)
    bd1 = 1.0 / np.sqrt(fsa_dim)
    p["dw1"] = _uniform(ks[6], (fsa_dim, 32), bd1)
    p["db1"] = _uniform(ks[7], (1, 32), bd1)
    bd2 = 1.0 / np.sqrt(32)
    p["dw2"] = _uniform(ks[8], (32, conv_out_size), bd2)
    p["db2"] = _uniform(ks[9], (1, conv_out_size), bd2)
    bf = 1.0 / np.sqrt(conv_out_size)
    p["fw1"] = _uniform(ks[10], (conv_out_size, 512), bf)
    p["fb1"] = _uniform(ks[11], (1, 512), bf)
    bh = 1.0 / np.sqrt(512)
    p["fw2"] = _uniform(ks[12], (512, 2 * n_actions), bh)
    p["fb2"] = _uniform(ks[13], (1, 2 * n_actions), bh)
    bq = 1.0 / np.sqrt(2 * n_actions + fsa_dim)
    p["qw"] = _uniform(ks[14], (2 * n_actions + fsa_dim, n_actions), bq)
    p["qb"] = _uniform(ks[15], (1, n_actions), bq)
    return p


def prepare_params(raw, conv_out_size, n_actions):
    """One-time prep: channel-major bf16 conv GEMM slabs, pre-padded / split /
    bf16-cast head weights.  Keeps per-forward-call XLA glue off the hot path."""
    P = _round_up(conv_out_size, 128)
    QP = _round_up(n_actions, 128)
    two_a = 2 * n_actions

    def conv_slab(w_taps):  # (KK, Cin, Cout) -> (Cin*KK, Cout) bf16
        KK, Cin, Cout = w_taps.shape
        return (jnp.transpose(w_taps, (1, 0, 2))
                .reshape(Cin * KK, Cout).astype(jnp.bfloat16))

    kp = {}
    kp["cw1s"], kp["cb1"] = conv_slab(raw["cw1"]), raw["cb1"]
    kp["cw2s"], kp["cb2"] = conv_slab(raw["cw2"]), raw["cb2"]
    kp["cw3s"], kp["cb3"] = conv_slab(raw["cw3"]), raw["cb3"]
    kp["dw1"], kp["db1"] = raw["dw1"], raw["db1"]
    kp["dw2_p"] = jnp.pad(raw["dw2"], ((0, 0), (0, P - conv_out_size)))
    kp["db2_p"] = jnp.pad(raw["db2"], ((0, 0), (0, P - conv_out_size)))
    kp["fw1_p"] = jnp.pad(raw["fw1"],
                          ((0, P - conv_out_size), (0, 0))).astype(jnp.bfloat16)
    kp["fb1"] = raw["fb1"]
    kp["fw2"] = raw["fw2"].astype(jnp.bfloat16)
    kp["fb2"] = raw["fb2"]
    kp["qwa_p"] = jnp.pad(raw["qw"][:two_a], ((0, 0), (0, QP - n_actions)))
    kp["qwb_p"] = jnp.pad(raw["qw"][two_a:], ((0, 0), (0, QP - n_actions)))
    kp["qb_p"] = jnp.pad(raw["qb"], ((0, 0), (0, QP - n_actions)))
    return kp


def fsadqn_forward(kp, image_nchw_u8, logic_seq_int, n_actions):
    """Returns (q, recon, conv_out) exactly as the PyTorch module does."""
    B = image_nchw_u8.shape[0]
    fx = image_nchw_u8.astype(jnp.float32) / 256.0       # image.float() / 256
    # k/256 with k in [0,255] is exact in bf16, so this cast loses nothing.
    x = jnp.transpose(fx, (0, 2, 3, 1)).astype(jnp.bfloat16)   # NCHW -> NHWC
    x = conv2d_relu(x, kp["cw1s"], kp["cb1"], 8, 4, out_dtype=jnp.bfloat16)
    x = conv2d_relu(x, kp["cw2s"], kp["cb2"], 4, 2, out_dtype=jnp.bfloat16)
    x = conv2d_relu(x, kp["cw3s"], kp["cb3"], 3, 1, out_dtype=jnp.float32)
    # match PyTorch's NCHW flatten order (XLA transpose glue)
    conv_out = jnp.transpose(x, (0, 3, 1, 2)).reshape(B, -1)
    logic = logic_seq_int[:, -1].astype(jnp.float32)      # x['logic'][:, -1]
    q, recon = heads(conv_out, logic, kp, n_actions)
    return q, recon, conv_out


# ----------------------------------------------------------------------------
# Pure-JAX f32 reference for correctness checking.
# ----------------------------------------------------------------------------
def reference_forward(params, image_nchw_u8, logic_seq_int):
    P = jax.lax.Precision.HIGHEST
    fx = image_nchw_u8.astype(jnp.float32) / 256.0
    x = jnp.transpose(fx, (0, 2, 3, 1))

    def conv(x, w_taps, b, ks, st):
        Cin, Cout = w_taps.shape[1], w_taps.shape[2]
        w = w_taps.reshape(ks, ks, Cin, Cout)                # HWIO
        y = jax.lax.conv_general_dilated(
            x, w, (st, st), "VALID",
            dimension_numbers=("NHWC", "HWIO", "NHWC"), precision=P)
        return jnp.maximum(y + b.reshape(1, 1, 1, -1), 0.0)

    x = conv(x, params["cw1"], params["cb1"], 8, 4)
    x = conv(x, params["cw2"], params["cb2"], 4, 2)
    x = conv(x, params["cw3"], params["cb3"], 3, 1)
    conv_out = jnp.transpose(x, (0, 3, 1, 2)).reshape(x.shape[0], -1)
    logic = logic_seq_int[:, -1].astype(jnp.float32)

    lin = lambda v, w, b: jnp.dot(v, w, precision=P) + b
    recon = lin(lin(logic, params["dw1"], params["db1"]),
                params["dw2"], params["db2"])
    diff = jnp.abs(conv_out - recon)
    diff = diff / jnp.max(diff)
    masked = conv_out * diff
    h1 = jnp.maximum(lin(masked, params["fw1"], params["fb1"]), 0.0)
    fc_out = jnp.maximum(lin(h1, params["fw2"], params["fb2"]), 0.0)
    appended = jnp.concatenate([fc_out, logic], axis=1)
    q = lin(appended, params["qw"], params["qb"])
    return q, recon, conv_out


if __name__ == "__main__":
    batch, in_ch, H, W = 2, 4, 36, 36          # conv output -> 64x1x1 = 64 feats
    n_actions = 6
    fsa_nvec = np.array([5, 3, 4] * in_ch, dtype=np.float32)     # len 12
    fsa_dim = int(fsa_nvec.shape[0]) // in_ch                    # = 3

    key = jax.random.PRNGKey(0)
    kimg, klog, kparam = jax.random.split(key, 3)
    image = jax.random.randint(kimg, (batch, in_ch, H, W), 0, 256,
                               dtype=jnp.int32).astype(jnp.uint8)
    logic_seq = jax.random.randint(klog, (batch, 5, fsa_dim), 0, 3,
                                   dtype=jnp.int32)

    cos = conv_out_size_fn(H, W)
    raw_params = init_params(kparam, in_ch, fsa_dim, n_actions, cos)
    kernel_params = prepare_params(raw_params, cos, n_actions)

    fwd = jax.jit(functools.partial(fsadqn_forward, n_actions=n_actions))
    q, recon, conv_out = fwd(kernel_params, image, logic_seq)
    q = jax.block_until_ready(q)

    q_ref, recon_ref, conv_ref = reference_forward(raw_params, image, logic_seq)

    assert q.shape == (batch, n_actions)
    assert recon.shape == (batch, cos)
    assert conv_out.shape == (batch, cos)
    for got, ref in ((q, q_ref), (recon, recon_ref), (conv_out, conv_ref)):
        assert bool(jnp.all(jnp.isfinite(got)))
        np.testing.assert_allclose(np.asarray(got), np.asarray(ref),
                                   rtol=1e-2, atol=1e-2)
    print("KERNEL_OK")
</pallas_src>

<mosaic_0001>
module attributes {stable_mosaic.version = 11 : i64} {
  func.func @_gemm_bias_relu_kernel(%arg0: i32, %arg1: memref<128x256xbf16, #tpu.memory_space<vmem>>, %arg2: memref<256x32xbf16, #tpu.memory_space<vmem>>, %arg3: memref<1x32xf32, #tpu.memory_space<vmem>>, %arg4: memref<128x32xbf16, #tpu.memory_space<vmem>>) attributes {dimension_semantics = [#tpu.dimension_semantics<parallel>], iteration_bounds = array<i64: 1>, scalar_prefetch = 0 : i64, scratch_operands = 0 : i64, tpu.core_type = #tpu.core_type<tc>, window_params = [{transform_indices = @transform_0, window_bounds = array<i64: 128, 256>}, {pipeline_mode = #tpu.pipeline_mode<synchronous>, transform_indices = @transform_1, window_bounds = array<i64: 256, 32>}, {pipeline_mode = #tpu.pipeline_mode<synchronous>, transform_indices = @transform_2, window_bounds = array<i64: 1, 32>}, {transform_indices = @transform_3, window_bounds = array<i64: 128, 32>}]} {
    %c0 = arith.constant 0 : index
    %c0_0 = arith.constant 0 : index
    %0 = vector.load %arg1[%c0, %c0_0] : memref<128x256xbf16, #tpu.memory_space<vmem>>, vector<128x256xbf16>
    %c0_1 = arith.constant 0 : index
    %c0_2 = arith.constant 0 : index
    %1 = vector.load %arg2[%c0_1, %c0_2] : memref<256x32xbf16, #tpu.memory_space<vmem>>, vector<256x32xbf16>
    %cst = arith.constant dense<0.000000e+00> : vector<128x32xf32>
    %2 = tpu.matmul %0, %1, %cst {dimension_numbers = #tpu.dot_dimension_numbers<[1], [0], [0], [1], [0, 0, 1, 1], [], []>} : vector<128x256xbf16>, vector<256x32xbf16>, vector<128x32xf32> -> vector<128x32xf32>
    %c0_3 = arith.constant 0 : index
    %c0_4 = arith.constant 0 : index
    %3 = vector.load %arg3[%c0_3, %c0_4] : memref<1x32xf32, #tpu.memory_space<vmem>>, vector<1x32xf32>
    %4 = vector.broadcast %3 : vector<1x32xf32> to vector<128x32xf32>
    %5 = arith.addf %2, %4 : vector<128x32xf32>
    %cst_5 = arith.constant 0.000000e+00 : f32
    %6 = vector.broadcast %cst_5 : f32 to vector<128x32xf32>
    %7 = arith.maximumf %5, %6 : vector<128x32xf32>
    %8 = arith.truncf %7 : vector<128x32xf32> to vector<128x32xbf16>
    %c0_6 = arith.constant 0 : index
    %c0_7 = arith.constant 0 : index
    %9 = vector.load %arg4[%c0_6, %c0_7] : memref<128x32xbf16, #tpu.memory_space<vmem>>, vector<128x32xbf16>
    tpu.vector_store %arg4[%c0_6, %c0_7], %8 {strides = array<i32>} : memref<128x32xbf16, #tpu.memory_space<vmem>>, vector<128x32xbf16>,
    return
  }
  func.func @transform_0(%arg0: i32) -> (i32, i32) {
    %c0_i32 = arith.constant 0 : i32
    %c0_i32_0 = arith.constant 0 : i32
    return %arg0, %c0_i32 : i32, i32
  }
  func.func @transform_1(%arg0: i32) -> (i32, i32) {
    %c0_i32 = arith.constant 0 : i32
    %c0_i32_0 = arith.constant 0 : i32
    %c0_i32_1 = arith.constant 0 : i32
    return %c0_i32, %c0_i32_0 : i32, i32
  }
  func.func @transform_2(%arg0: i32) -> (i32, i32) {
    %c0_i32 = arith.constant 0 : i32
    %c0_i32_0 = arith.constant 0 : i32
    %c0_i32_1 = arith.constant 0 : i32
    return %c0_i32, %c0_i32_0 : i32, i32
  }
  func.func @transform_3(%arg0: i32) -> (i32, i32) {
    %c0_i32 = arith.constant 0 : i32
    %c0_i32_0 = arith.constant 0 : i32
    return %arg0, %c0_i32 : i32, i32
  }
}

module attributes {stable_mosaic.version = 11 : i64} {
  func.func @_gemm_bias_relu_kernel(%arg0: i32, %arg1: memref<18x512xbf16, #tpu.memory_space<vmem>>, %arg2: memref<512x64xbf16, #tpu.memory_space<vmem>>, %arg3: memref<1x64xf32, #tpu.memory_space<vmem>>, %arg4: memref<18x64xbf16, #tpu.memory_space<vmem>>) attributes {dimension_semantics = [#tpu.dimension_semantics<parallel>], iteration_bounds = array<i64: 1>, scalar_prefetch = 0 : i64, scratch_operands = 0 : i64, tpu.core_type = #tpu.core_type<tc>, window_params = [{transform_indices = @transform_0, window_bounds = array<i64: 18, 512>}, {pipeline_mode = #tpu.pipeline_mode<synchronous>, transform_indices = @transform_1, window_bounds = array<i64: 512, 64>}, {pipeline_mode = #tpu.pipeline_mode<synchronous>, transform_indices = @transform_2, window_bounds = array<i64: 1, 64>}, {transform_indices = @transform_3, window_bounds = array<i64: 18, 64>}]} {
    %c0 = arith.constant 0 : index
    %c0_0 = arith.constant 0 : index
    %0 = vector.load %arg1[%c0, %c0_0] : memref<18x512xbf16, #tpu.memory_space<vmem>>, vector<18x512xbf16>
    %c0_1 = arith.constant 0 : index
    %c0_2 = arith.constant 0 : index
    %1 = vector.load %arg2[%c0_1, %c0_2] : memref<512x64xbf16, #tpu.memory_space<vmem>>, vector<512x64xbf16>
    %cst = arith.constant dense<0.000000e+00> : vector<18x64xf32>
    %2 = tpu.matmul %0, %1, %cst {dimension_numbers = #tpu.dot_dimension_numbers<[1], [0], [0], [1], [0, 0, 1, 1], [], []>} : vector<18x512xbf16>, vector<512x64xbf16>, vector<18x64xf32> -> vector<18x64xf32>
    %c0_3 = arith.constant 0 : index
    %c0_4 = arith.constant 0 : index
    %3 = vector.load %arg3[%c0_3, %c0_4] : memref<1x64xf32, #tpu.memory_space<vmem>>, vector<1x64xf32>
    %4 = vector.broadcast %3 : vector<1x64xf32> to vector<18x64xf32>
    %5 = arith.addf %2, %4 : vector<18x64xf32>
    %cst_5 = arith.constant 0.000000e+00 : f32
    %6 = vector.broadcast %cst_5 : f32 to vector<18x64xf32>
    %7 = arith.maximumf %5, %6 : vector<18x64xf32>
    %8 = arith.truncf %7 : vector<18x64xf32> to vector<18x64xbf16>
    %c0_6 = arith.constant 0 : index
    %c0_7 = arith.constant 0 : index
    %9 = vector.load %arg4[%c0_6, %c0_7] : memref<18x64xbf16, #tpu.memory_space<vmem>>, vector<18x64xbf16>
    tpu.vector_store %arg4[%c0_6, %c0_7], %8 {strides = array<i32>} : memref<18x64xbf16, #tpu.memory_space<vmem>>, vector<18x64xbf16>,
    return
  }
  func.func @transform_0(%arg0: i32) -> (i32, i32) {
    %c0_i32 = arith.constant 0 : i32
    %c0_i32_0 = arith.constant 0 : i32
    return %arg0, %c0_i32 : i32, i32
  }
  func.func @transform_1(%arg0: i32) -> (i32, i32) {
    %c0_i32 = arith.constant 0 : i32
    %c0_i32_0 = arith.constant 0 : i32
    %c0_i32_1 = arith.constant 0 : i32
    return %c0_i32, %c0_i32_0 : i32, i32
  }
  func.func @transform_2(%arg0: i32) -> (i32, i32) {
    %c0_i32 = arith.constant 0 : i32
    %c0_i32_0 = arith.constant 0 : i32
    %c0_i32_1 = arith.constant 0 : i32
    return %c0_i32, %c0_i32_0 : i32, i32
  }
  func.func @transform_3(%arg0: i32) -> (i32, i32) {
    %c0_i32 = arith.constant 0 : i32
    %c0_i32_0 = arith.constant 0 : i32
    return %arg0, %c0_i32 : i32, i32
  }
}

module attributes {stable_mosaic.version = 11 : i64} {
  func.func @_gemm_bias_relu_kernel(%arg0: i32, %arg1: memref<2x576xbf16, #tpu.memory_space<vmem>>, %arg2: memref<576x64xbf16, #tpu.memory_space<vmem>>, %arg3: memref<1x64xf32, #tpu.memory_space<vmem>>, %arg4: memref<2x64xf32, #tpu.memory_space<vmem>>) attributes {dimension_semantics = [#tpu.dimension_semantics<parallel>], iteration_bounds = array<i64: 1>, scalar_prefetch = 0 : i64, scratch_operands = 0 : i64, tpu.core_type = #tpu.core_type<tc>, window_params = [{transform_indices = @transform_0, window_bounds = array<i64: 2, 576>}, {pipeline_mode = #tpu.pipeline_mode<synchronous>, transform_indices = @transform_1, window_bounds = array<i64: 576, 64>}, {pipeline_mode = #tpu.pipeline_mode<synchronous>, transform_indices = @transform_2, window_bounds = array<i64: 1, 64>}, {transform_indices = @transform_3, window_bounds = array<i64: 2, 64>}]} {
    %c0 = arith.constant 0 : index
    %c0_0 = arith.constant 0 : index
    %0 = vector.load %arg1[%c0, %c0_0] : memref<2x576xbf16, #tpu.memory_space<vmem>>, vector<2x576xbf16>
    %c0_1 = arith.constant 0 : index
    %c0_2 = arith.constant 0 : index
    %1 = vector.load %arg2[%c0_1, %c0_2] : memref<576x64xbf16, #tpu.memory_space<vmem>>, vector<576x64xbf16>
    %cst = arith.constant dense<0.000000e+00> : vector<2x64xf32>
    %2 = tpu.matmul %0, %1, %cst {dimension_numbers = #tpu.dot_dimension_numbers<[1], [0], [0], [1], [0, 0, 1, 1], [], []>} : vector<2x576xbf16>, vector<576x64xbf16>, vector<2x64xf32> -> vector<2x64xf32>
    %c0_3 = arith.constant 0 : index
    %c0_4 = arith.constant 0 : index
    %3 = vector.load %arg3[%c0_3, %c0_4] : memref<1x64xf32, #tpu.memory_space<vmem>>, vector<1x64xf32>
    %4 = vector.broadcast %3 : vector<1x64xf32> to vector<2x64xf32>
    %5 = arith.addf %2, %4 : vector<2x64xf32>
    %cst_5 = arith.constant 0.000000e+00 : f32
    %6 = vector.broadcast %cst_5 : f32 to vector<2x64xf32>
    %7 = arith.maximumf %5, %6 : vector<2x64xf32>
    %c0_6 = arith.constant 0 : index
    %c0_7 = arith.constant 0 : index
    %8 = vector.load %arg4[%c0_6, %c0_7] : memref<2x64xf32, #tpu.memory_space<vmem>>, vector<2x64xf32>
    tpu.vector_store %arg4[%c0_6, %c0_7], %7 {strides = array<i32>} : memref<2x64xf32, #tpu.memory_space<vmem>>, vector<2x64xf32>,
    return
  }
  func.func @transform_0(%arg0: i32) -> (i32, i32) {
    %c0_i32 = arith.constant 0 : i32
    %c0_i32_0 = arith.constant 0 : i32
    return %arg0, %c0_i32 : i32, i32
  }
  func.func @transform_1(%arg0: i32) -> (i32, i32) {
    %c0_i32 = arith.constant 0 : i32
    %c0_i32_0 = arith.constant 0 : i32
    %c0_i32_1 = arith.constant 0 : i32
    return %c0_i32, %c0_i32_0 : i32, i32
  }
  func.func @transform_2(%arg0: i32) -> (i32, i32) {
    %c0_i32 = arith.constant 0 : i32
    %c0_i32_0 = arith.constant 0 : i32
    %c0_i32_1 = arith.constant 0 : i32
    return %c0_i32, %c0_i32_0 : i32, i32
  }
  func.func @transform_3(%arg0: i32) -> (i32, i32) {
    %c0_i32 = arith.constant 0 : i32
    %c0_i32_0 = arith.constant 0 : i32
    return %arg0, %c0_i32 : i32, i32
  }
}

module attributes {stable_mosaic.version = 11 : i64} {
  func.func @_recon_max_kernel(%arg0: i32, %arg1: memref<2x3xf32, #tpu.memory_space<vmem>>, %arg2: memref<2x128xf32, #tpu.memory_space<vmem>>, %arg3: memref<3x32xf32, #tpu.memory_space<vmem>>, %arg4: memref<1x32xf32, #tpu.memory_space<vmem>>, %arg5: memref<32x128xf32, #tpu.memory_space<vmem>>, %arg6: memref<1x128xf32, #tpu.memory_space<vmem>>, %arg7: memref<2x128xf32, #tpu.memory_space<vmem>>, %arg8: memref<1x1xf32, #tpu.memory_space<vmem>>, %arg9: memref<1x1xf32, #tpu.memory_space<vmem>>) attributes {dimension_semantics = [#tpu.dimension_semantics<arbitrary>], iteration_bounds = array<i64: 1>, scalar_prefetch = 0 : i64, scratch_operands = 1 : i64, tpu.core_type = #tpu.core_type<tc>, window_params = [{transform_indices = @transform_0, window_bounds = array<i64: 2, 3>}, {transform_indices = @transform_1, window_bounds = array<i64: 2, 128>}, {pipeline_mode = #tpu.pipeline_mode<synchronous>, transform_indices = @transform_2, window_bounds = array<i64: 3, 32>}, {pipeline_mode = #tpu.pipeline_mode<synchronous>, transform_indices = @transform_3, window_bounds = array<i64: 1, 32>}, {pipeline_mode = #tpu.pipeline_mode<synchronous>, transform_indices = @transform_4, window_bounds = array<i64: 32, 128>}, {pipeline_mode = #tpu.pipeline_mode<synchronous>, transform_indices = @transform_5, window_bounds = array<i64: 1, 128>}, {transform_indices = @transform_6, window_bounds = array<i64: 2, 128>}, {pipeline_mode = #tpu.pipeline_mode<synchronous>, transform_indices = @transform_7, window_bounds = array<i64: 1, 1>}]} {
    %c0 = arith.constant 0 : index
    %c0_0 = arith.constant 0 : index
    %0 = vector.load %arg1[%c0, %c0_0] : memref<2x3xf32, #tpu.memory_space<vmem>>, vector<2x3xf32>
    %c0_1 = arith.constant 0 : index
    %c0_2 = arith.constant 0 : index
    %1 = vector.load %arg3[%c0_1, %c0_2] : memref<3x32xf32, #tpu.memory_space<vmem>>, vector<3x32xf32>
    %cst = arith.constant dense<0.000000e+00> : vector<2x32xf32>
    %2 = tpu.matmul %0, %1, %cst {dimension_numbers = #tpu.dot_dimension_numbers<[1], [0], [0], [1], [0, 0, 1, 1], [], []>} : vector<2x3xf32>, vector<3x32xf32>, vector<2x32xf32> -> vector<2x32xf32>
    %c0_3 = arith.constant 0 : index
    %c0_4 = arith.constant 0 : index
    %3 = vector.load %arg4[%c0_3, %c0_4] : memref<1x32xf32, #tpu.memory_space<vmem>>, vector<1x32xf32>
    %4 = vector.broadcast %3 : vector<1x32xf32> to vector<2x32xf32>
    %5 = arith.addf %2, %4 : vector<2x32xf32>
    %c0_5 = arith.constant 0 : index
    %c0_6 = arith.constant 0 : index
    %6 = vector.load %arg5[%c0_5, %c0_6] : memref<32x128xf32, #tpu.memory_space<vmem>>, vector<32x128xf32>
    %cst_7 = arith.constant dense<0.000000e+00> : vector<2x128xf32>
    %7 = tpu.matmul %5, %6, %cst_7 {dimension_numbers = #tpu.dot_dimension_numbers<[1], [0], [0], [1], [0, 0, 1, 1], [], []>} : vector<2x32xf32>, vector<32x128xf32>, vector<2x128xf32> -> vector<2x128xf32>
    %c0_8 = arith.constant 0 : index
    %c0_9 = arith.constant 0 : index
    %8 = vector.load %arg6[%c0_8, %c0_9] : memref<1x128xf32, #tpu.memory_space<vmem>>, vector<1x128xf32>
    %9 = vector.broadcast %8 : vector<1x128xf32> to vector<2x128xf32>
    %10 = arith.addf %7, %9 : vector<2x128xf32>
    %c0_10 = arith.constant 0 : index
    %c0_11 = arith.constant 0 : index
    %11 = vector.load %arg7[%c0_10, %c0_11] : memref<2x128xf32, #tpu.memory_space<vmem>>, vector<2x128xf32>
    tpu.vector_store %arg7[%c0_10, %c0_11], %10 {strides = array<i32>} : memref<2x128xf32, #tpu.memory_space<vmem>>, vector<2x128xf32>,
    %c0_12 = arith.constant 0 : index
    %c0_13 = arith.constant 0 : index
    %12 = vector.load %arg2[%c0_12, %c0_13] : memref<2x128xf32, #tpu.memory_space<vmem>>, vector<2x128xf32>
    %13 = arith.subf %12, %10 : vector<2x128xf32>
    %14 = math.absf %13 : vector<2x128xf32>
    %cst_14 = arith.constant dense<0xFF800000> : vector<2xf32>
    %15 = vector.multi_reduction <maximumf>, %14, %cst_14 [1] : vector<2x128xf32> to vector<2xf32>
    %16 = vector.shape_cast %15 : vector<2xf32> to vector<2x1xf32>
    %cst_15 = arith.constant dense<0xFF800000> : vector<1xf32>
    %17 = vector.multi_reduction <maximumf>, %16, %cst_15 [0] : vector<2x1xf32> to vector<1xf32>
    %18 = vector.shape_cast %17 : vector<1xf32> to vector<1x1xf32>
    %c0_i32 = arith.constant 0 : i32
    %19 = arith.cmpi eq, %arg0, %c0_i32 : i32
    %20 = arith.extui %19 : i1 to i32
    %c0_i32_16 = arith.constant 0 : i32
    %21 = arith.cmpi ne, %20, %c0_i32_16 : i32
    scf.if %21 {
      %c0_21 = arith.constant 0 : index
      %c0_22 = arith.constant 0 : index
      %28 = vector.load %arg9[%c0_21, %c0_22] : memref<1x1xf32, #tpu.memory_space<vmem>>, vector<1x1xf32>
      tpu.vector_store %arg9[%c0_21, %c0_22], %18 {strides = array<i32>} : memref<1x1xf32, #tpu.memory_space<vmem>>, vector<1x1xf32>,
    } else {
    }
    %c0_i32_17 = arith.constant 0 : i32
    %22 = arith.cmpi sgt, %arg0, %c0_i32_17 : i32
    %23 = arith.extui %22 : i1 to i32
    %c0_i32_18 = arith.constant 0 : i32
    %24 = arith.cmpi ne, %23, %c0_i32_18 : i32
    scf.if %24 {
      %c0_21 = arith.constant 0 : index
      %c0_22 = arith.constant 0 : index
      %28 = vector.load %arg9[%c0_21, %c0_22] : memref<1x1xf32, #tpu.memory_space<vmem>>, vector<1x1xf32>
      %29 = arith.maximumf %28, %18 : vector<1x1xf32>
      %c0_23 = arith.constant 0 : index
      %c0_24 = arith.constant 0 : index
      %30 = vector.load %arg9[%c0_23, %c0_24] : memref<1x1xf32, #tpu.memory_space<vmem>>, vector<1x1xf32>
      tpu.vector_store %arg9[%c0_23, %c0_24], %29 {strides = array<i32>} : memref<1x1xf32, #tpu.memory_space<vmem>>, vector<1x1xf32>,
    } else {
    }
    %c0_i32_19 = arith.constant 0 : i32
    %25 = arith.cmpi eq, %arg0, %c0_i32_19 : i32
    %26 = arith.extui %25 : i1 to i32
    %c0_i32_20 = arith.constant 0 : i32
    %27 = arith.cmpi ne, %26, %c0_i32_20 : i32
    scf.if %27 {
      %c0_21 = arith.constant 0 : index
      %c0_22 = arith.constant 0 : index
      %28 = vector.load %arg9[%c0_21, %c0_22] : memref<1x1xf32, #tpu.memory_space<vmem>>, vector<1x1xf32>
      %c0_23 = arith.constant 0 : index
      %c0_24 = arith.constant 0 : index
      %29 = vector.load %arg8[%c0_23, %c0_24] : memref<1x1xf32, #tpu.memory_space<vmem>>, vector<1x1xf32>
      tpu.vector_store %arg8[%c0_23, %c0_24], %28 {strides = array<i32>} : memref<1x1xf32, #tpu.memory_space<vmem>>, vector<1x1xf32>,
    } else {
    }
    return
  }
  func.func @transform_0(%arg0: i32) -> (i32, i32) {
    %c0_i32 = arith.constant 0 : i32
    %c0_i32_0 = arith.constant 0 : i32
    return %arg0, %c0_i32 : i32, i32
  }
  func.func @transform_1(%arg0: i32) -> (i32, i32) {
    %c0_i32 = arith.constant 0 : i32
    %c0_i32_0 = arith.constant 0 : i32
    return %arg0, %c0_i32 : i32, i32
  }
  func.func @transform_2(%arg0: i32) -> (i32, i32) {
    %c0_i32 = arith.constant 0 : i32
    %c0_i32_0 = arith.constant 0 : i32
    %c0_i32_1 = arith.constant 0 : i32
    return %c0_i32, %c0_i32_0 : i32, i32
  }
  func.func @transform_3(%arg0: i32) -> (i32, i32) {
    %c0_i32 = arith.constant 0 : i32
    %c0_i32_0 = arith.constant 0 : i32
    %c0_i32_1 = arith.constant 0 : i32
    return %c0_i32, %c0_i32_0 : i32, i32
  }
  func.func @transform_4(%arg0: i32) -> (i32, i32) {
    %c0_i32 = arith.constant 0 : i32
    %c0_i32_0 = arith.constant 0 : i32
    %c0_i32_1 = arith.constant 0 : i32
    return %c0_i32, %c0_i32_0 : i32, i32
  }
  func.func @transform_5(%arg0: i32) -> (i32, i32) {
    %c0_i32 = arith.constant 0 : i32
    %c0_i32_0 = arith.constant 0 : i32
    %c0_i32_1 = arith.constant 0 : i32
    return %c0_i32, %c0_i32_0 : i32, i32
  }
  func.func @transform_6(%arg0: i32) -> (i32, i32) {
    %c0_i32 = arith.constant 0 : i32
    %c0_i32_0 = arith.constant 0 : i32
    return %arg0, %c0_i32 : i32, i32
  }
  func.func @transform_7(%arg0: i32) -> (i32, i32) {
    %c0_i32 = arith.constant 0 : i32
    %c0_i32_0 = arith.constant 0 : i32
    %c0_i32_1 = arith.constant 0 : i32
    return %c0_i32, %c0_i32_0 : i32, i32
  }
}

module attributes {stable_mosaic.version = 11 : i64} {
  func.func @_gated_fc_kernel(%arg0: i32, %arg1: memref<2x128xf32, #tpu.memory_space<vmem>>, %arg2: memref<2x128xf32, #tpu.memory_space<vmem>>, %arg3: memref<2x3xf32, #tpu.memory_space<vmem>>, %arg4: memref<1x1xf32, #tpu.memory_space<vmem>>, %arg5: memref<128x512xbf16, #tpu.memory_space<vmem>>, %arg6: memref<1x512xf32, #tpu.memory_space<vmem>>, %arg7: memref<512x12xbf16, #tpu.memory_space<vmem>>, %arg8: memref<1x12xf32, #tpu.memory_space<vmem>>, %arg9: memref<12x128xf32, #tpu.memory_space<vmem>>, %arg10: memref<3x128xf32, #tpu.memory_space<vmem>>, %arg11: memref<1x128xf32, #tpu.memory_space<vmem>>, %arg12: memref<2x128xf32, #tpu.memory_space<vmem>>) attributes {dimension_semantics = [#tpu.dimension_semantics<parallel>], iteration_bounds = array<i64: 1>, scalar_prefetch = 0 : i64, scratch_operands = 0 : i64, tpu.core_type = #tpu.core_type<tc>, window_params = [{transform_indices = @transform_0, window_bounds = array<i64: 2, 128>}, {transform_indices = @transform_1, window_bounds = array<i64: 2, 128>}, {transform_indices = @transform_2, window_bounds = array<i64: 2, 3>}, {pipeline_mode = #tpu.pipeline_mode<synchronous>, transform_indices = @transform_3, window_bounds = array<i64: 1, 1>}, {pipeline_mode = #tpu.pipeline_mode<synchronous>, transform_indices = @transform_4, window_bounds = array<i64: 128, 512>}, {pipeline_mode = #tpu.pipeline_mode<synchronous>, transform_indices = @transform_5, window_bounds = array<i64: 1, 512>}, {pipeline_mode = #tpu.pipeline_mode<synchronous>, transform_indices = @transform_6, window_bounds = array<i64: 512, 12>}, {pipeline_mode = #tpu.pipeline_mode<synchronous>, transform_indices = @transform_7, window_bounds = array<i64: 1, 12>}, {pipeline_mode = #tpu.pipeline_mode<synchronous>, transform_indices = @transform_8, window_bounds = array<i64: 12, 128>}, {pipeline_mode = #tpu.pipeline_mode<synchronous>, transform_indices = @transform_9, window_bounds = array<i64: 3, 128>}, {pipeline_mode = #tpu.pipeline_mode<synchronous>, transform_indices = @transform_10, window_bounds = array<i64: 1, 128>}, {transform_indices = @transform_11, window_bounds = array<i64: 2, 128>}]} {
    %c0 = arith.constant 0 : index
    %c0_0 = arith.constant 0 : index
    %0 = vector.load %arg1[%c0, %c0_0] : memref<2x128xf32, #tpu.memory_space<vmem>>, vector<2x128xf32>
    %c0_1 = arith.constant 0 : index
    %c0_2 = arith.constant 0 : index
    %1 = vector.load %arg2[%c0_1, %c0_2] : memref<2x128xf32, #tpu.memory_space<vmem>>, vector<2x128xf32>
    %2 = arith.subf %0, %1 : vector<2x128xf32>
    %3 = math.absf %2 : vector<2x128xf32>
    %c0_3 = arith.constant 0 : index
    %c0_4 = arith.constant 0 : index
    %4 = vector.load %arg4[%c0_3, %c0_4] : memref<1x1xf32, #tpu.memory_space<vmem>>, vector<1x1xf32>
    %5 = tpu.reciprocal %4 : vector<1x1xf32> -> vector<1x1xf32>
    %6 = arith.mulf %0, %3 : vector<2x128xf32>
    %7 = vector.broadcast %5 : vector<1x1xf32> to vector<2x128xf32>
    %8 = arith.mulf %6, %7 : vector<2x128xf32>
    %9 = arith.truncf %8 : vector<2x128xf32> to vector<2x128xbf16>
    %c0_5 = arith.constant 0 : index
    %c0_6 = arith.constant 0 : index
    %10 = vector.load %arg5[%c0_5, %c0_6] : memref<128x512xbf16, #tpu.memory_space<vmem>>, vector<128x512xbf16>
    %cst = arith.constant dense<0.000000e+00> : vector<2x512xf32>
    %11 = tpu.matmul %9, %10, %cst {dimension_numbers = #tpu.dot_dimension_numbers<[1], [0], [0], [1], [0, 0, 1, 1], [], []>} : vector<2x128xbf16>, vector<128x512xbf16>, vector<2x512xf32> -> vector<2x512xf32>
    %c0_7 = arith.constant 0 : index
    %c0_8 = arith.constant 0 : index
    %12 = vector.load %arg6[%c0_7, %c0_8] : memref<1x512xf32, #tpu.memory_space<vmem>>, vector<1x512xf32>
    %13 = vector.broadcast %12 : vector<1x512xf32> to vector<2x512xf32>
    %14 = arith.addf %11, %13 : vector<2x512xf32>
    %cst_9 = arith.constant 0.000000e+00 : f32
    %15 = vector.broadcast %cst_9 : f32 to vector<2x512xf32>
    %16 = arith.maximumf %14, %15 : vector<2x512xf32>
    %17 = arith.truncf %16 : vector<2x512xf32> to vector<2x512xbf16>
    %c0_10 = arith.constant 0 : index
    %c0_11 = arith.constant 0 : index
    %18 = vector.load %arg7[%c0_10, %c0_11] : memref<512x12xbf16, #tpu.memory_space<vmem>>, vector<512x12xbf16>
    %cst_12 = arith.constant dense<0.000000e+00> : vector<2x12xf32>
    %19 = tpu.matmul %17, %18, %cst_12 {dimension_numbers = #tpu.dot_dimension_numbers<[1], [0], [0], [1], [0, 0, 1, 1], [], []>} : vector<2x512xbf16>, vector<512x12xbf16>, vector<2x12xf32> -> vector<2x12xf32>
    %c0_13 = arith.constant 0 : index
    %c0_14 = arith.constant 0 : index
    %20 = vector.load %arg8[%c0_13, %c0_14] : memref<1x12xf32, #tpu.memory_space<vmem>>, vector<1x12xf32>
    %21 = vector.broadcast %20 : vector<1x12xf32> to vector<2x12xf32>
    %22 = arith.addf %19, %21 : vector<2x12xf32>
    %cst_15 = arith.constant 0.000000e+00 : f32
    %23 = vector.broadcast %cst_15 : f32 to vector<2x12xf32>
    %24 = arith.maximumf %22, %23 : vector<2x12xf32>
    %c0_16 = arith.constant 0 : index
    %c0_17 = arith.constant 0 : index
    %25 = vector.load %arg9[%c0_16, %c0_17] : memref<12x128xf32, #tpu.memory_space<vmem>>, vector<12x128xf32>
    %cst_18 = arith.constant dense<0.000000e+00> : vector<2x128xf32>
    %26 = tpu.matmul %24, %25, %cst_18 {dimension_numbers = #tpu.dot_dimension_numbers<[1], [0], [0], [1], [0, 0, 1, 1], [], []>} : vector<2x12xf32>, vector<12x128xf32>, vector<2x128xf32> -> vector<2x128xf32>
    %c0_19 = arith.constant 0 : index
    %c0_20 = arith.constant 0 : index
    %27 = vector.load %arg3[%c0_19, %c0_20] : memref<2x3xf32, #tpu.memory_space<vmem>>, vector<2x3xf32>
    %c0_21 = arith.constant 0 : index
    %c0_22 = arith.constant 0 : index
    %28 = vector.load %arg10[%c0_21, %c0_22] : memref<3x128xf32, #tpu.memory_space<vmem>>, vector<3x128xf32>
    %cst_23 = arith.constant dense<0.000000e+00> : vector<2x128xf32>
    %29 = tpu.matmul %27, %28, %cst_23 {dimension_numbers = #tpu.dot_dimension_numbers<[1], [0], [0], [1], [0, 0, 1, 1], [], []>} : vector<2x3xf32>, vector<3x128xf32>, vector<2x128xf32> -> vector<2x128xf32>
    %30 = arith.addf %26, %29 : vector<2x128xf32>
    %c0_24 = arith.constant 0 : index
    %c0_25 = arith.constant 0 : index
    %31 = vector.load %arg11[%c0_24, %c0_25] : memref<1x128xf32, #tpu.memory_space<vmem>>, vector<1x128xf32>
    %32 = vector.broadcast %31 : vector<1x128xf32> to vector<2x128xf32>
    %33 = arith.addf %30, %32 : vector<2x128xf32>
    %c0_26 = arith.constant 0 : index
    %c0_27 = arith.constant 0 : index
    %34 = vector.load %arg12[%c0_26, %c0_27] : memref<2x128xf32, #tpu.memory_space<vmem>>, vector<2x128xf32>
    tpu.vector_store %arg12[%c0_26, %c0_27], %33 {strides = array<i32>} : memref<2x128xf32, #tpu.memory_space<vmem>>, vector<2x128xf32>,
    return
  }
  func.func @transform_0(%arg0: i32) -> (i32, i32) {
    %c0_i32 = arith.constant 0 : i32
    %c0_i32_0 = arith.constant 0 : i32
    return %arg0, %c0_i32 : i32, i32
  }
  func.func @transform_1(%arg0: i32) -> (i32, i32) {
    %c0_i32 = arith.constant 0 : i32
    %c0_i32_0 = arith.constant 0 : i32
    return %arg0, %c0_i32 : i32, i32
  }
  func.func @transform_2(%arg0: i32) -> (i32, i32) {
    %c0_i32 = arith.constant 0 : i32
    %c0_i32_0 = arith.constant 0 : i32
    return %arg0, %c0_i32 : i32, i32
  }
  func.func @transform_3(%arg0: i32) -> (i32, i32) {
    %c0_i32 = arith.constant 0 : i32
    %c0_i32_0 = arith.constant 0 : i32
    %c0_i32_1 = arith.constant 0 : i32
    return %c0_i32, %c0_i32_0 : i32, i32
  }
  func.func @transform_4(%arg0: i32) -> (i32, i32) {
    %c0_i32 = arith.constant 0 : i32
    %c0_i32_0 = arith.constant 0 : i32
    %c0_i32_1 = arith.constant 0 : i32
    return %c0_i32, %c0_i32_0 : i32, i32
  }
  func.func @transform_5(%arg0: i32) -> (i32, i32) {
    %c0_i32 = arith.constant 0 : i32
    %c0_i32_0 = arith.constant 0 : i32
    %c0_i32_1 = arith.constant 0 : i32
    return %c0_i32, %c0_i32_0 : i32, i32
  }
  func.func @transform_6(%arg0: i32) -> (i32, i32) {
    %c0_i32 = arith.constant 0 : i32
    %c0_i32_0 = arith.constant 0 : i32
    %c0_i32_1 = arith.constant 0 : i32
    return %c0_i32, %c0_i32_0 : i32, i32
  }
  func.func @transform_7(%arg0: i32) -> (i32, i32) {
    %c0_i32 = arith.constant 0 : i32
    %c0_i32_0 = arith.constant 0 : i32
    %c0_i32_1 = arith.constant 0 : i32
    return %c0_i32, %c0_i32_0 : i32, i32
  }
  func.func @transform_8(%arg0: i32) -> (i32, i32) {
    %c0_i32 = arith.constant 0 : i32
    %c0_i32_0 = arith.constant 0 : i32
    %c0_i32_1 = arith.constant 0 : i32
    return %c0_i32, %c0_i32_0 : i32, i32
  }
  func.func @transform_9(%arg0: i32) -> (i32, i32) {
    %c0_i32 = arith.constant 0 : i32
    %c0_i32_0 = arith.constant 0 : i32
    %c0_i32_1 = arith.constant 0 : i32
    return %c0_i32, %c0_i32_0 : i32, i32
  }
  func.func @transform_10(%arg0: i32) -> (i32, i32) {
    %c0_i32 = arith.constant 0 : i32
    %c0_i32_0 = arith.constant 0 : i32
    %c0_i32_1 = arith.constant 0 : i32
    return %c0_i32, %c0_i32_0 : i32, i32
  }
  func.func @transform_11(%arg0: i32) -> (i32, i32) {
    %c0_i32 = arith.constant 0 : i32
    %c0_i32_0 = arith.constant 0 : i32
    return %arg0, %c0_i32 : i32, i32
  }
}

</mosaic_0001>

<bundles_post_ra>
// kernel: fsadqn_forward.5
= control target key start
LH: loop header
LB: loop body
LE: loop exit
PB: predicated region body
PF: predicated region fallthrough
CT: control target
= control target key end

     0   :  { %vm423_vm0 = vcmask 257024   ;;  %s830_s1 = inlined_call_operand.vmem [shape: bf16[256,32], index: 1, kind: input, shape index: {}]   ;;  %s831_s0 = inlined_call_operand.vmem [shape: bf16[128,256], index: 0, kind: input, shape index: {}]   ;;  %s832_s2 = inlined_call_operand.vmem [shape: f32[1,32], index: 2, kind: input, shape index: {}]   ;;  %s833_s3 = inlined_call_operand.vmem [shape: bf16[128,32], index: 3, kind: output, shape index: {}]  }
   0x1   :  { %v589_v0 = vld [vmem:[%s830_s1 + $0x40] sm:$0xff]   ;;  %v591_v2 = vld [vmem:[%s830_s1 + $0x48] sm:$0xff]   ;;  %v593_v4 = vld [vmem:[%s830_s1 + $0x50] sm:$0xff]  }
   0x2   :  { %v590_v1 = vld [vmem:[%s830_s1] sm:$0xff]   ;;  %509 = vmatprep.subr.bf16.mxu0 %v589_v0  ;;  %573 = vmatprep.subr.bf16.mxu1 %v589_v0  ;;  %v592_v3 = vld [vmem:[%s830_s1 + $0x8] sm:$0xff]   ;;  %v594_v5 = vld [vmem:[%s830_s1 + $0x10] sm:$0xff]  }
   0x3   :  { %510 = vmatpush3.bf16.msra.mxu0 %v590_v1  ;;  %581 = vmatpush3.bf16.msra.mxu1 %v590_v1  ;;  %v595_v6 = vld [vmem:[%s830_s1 + $0x58] sm:$0xff]   ;;  %v597_v8 = vld [vmem:[%s830_s1 + $0x60] sm:$0xff]   ;;  %v599_v10 = vld [vmem:[%s830_s1 + $0x68] sm:$0xff]  }
   0x4   :  { %511 = vmatprep.subr.bf16.mxu0 %v591_v2  ;;  %574 = vmatprep.subr.bf16.mxu1 %v591_v2  ;;  %v596_v7 = vld [vmem:[%s830_s1 + $0x18] sm:$0xff]   ;;  %v598_v9 = vld [vmem:[%s830_s1 + $0x20] sm:$0xff]   ;;  %v600_v13 = vld [vmem:[%s830_s1 + $0x28] sm:$0xff]  }
   0x5   :  { %v607_v11 = vld [vmem:[%s831_s0 + $0x4] ss:$8 sps:$4 sm:$0xff]   ;;  %v601_v14 = vld [vmem:[%s830_s1 + $0x70] sm:$0xff]   ;;  %v603_v16 = vld [vmem:[%s830_s1 + $0x78] sm:$0xff]  }
   0x6   :  { %v610_v12 = vld [vmem:[%s831_s0 + $0x44] ss:$8 sps:$4 sm:$0xff]   ;;  %278 = vmatprep.mubr.bf16.mxu0 %v607_v11  ;;  %v602_v15 = vld [vmem:[%s830_s1 + $0x30] sm:$0xff]   ;;  %v604_v17 = vld [vmem:[%s830_s1 + $0x38] sm:$0xff]  }
   0x7   :  { %512 = vmatpush3.bf16.msra.mxu0 %v592_v3  ;;  %582 = vmatpush3.bf16.msra.mxu1 %v592_v3  ;;  %v605_v18 = vld [vmem:[%s831_s0] ss:$8 sps:$4 sm:$0xff]   ;;  %v611_v20 = vld [vmem:[%s831_s0 + $0x14] ss:$8 sps:$4 sm:$0xff]   ;;  %v615_v22 = vld [vmem:[%s831_s0 + $0x10] ss:$8 sps:$4 sm:$0xff]  }
   0x8   :  { %513 = vmatprep.subr.bf16.mxu0 %v593_v4  ;;  %575 = vmatprep.subr.bf16.mxu1 %v593_v4  ;;  %v608_v19 = vld [vmem:[%s831_s0 + $0x40] ss:$8 sps:$4 sm:$0xff]   ;;  %v613_v21 = vld [vmem:[%s831_s0 + $0x54] ss:$8 sps:$4 sm:$0xff]   ;;  %v616_v23 = vld [vmem:[%s831_s0 + $0x50] ss:$8 sps:$4 sm:$0xff]  }
   0x9   :  { %310 = vmatprep.mubr.bf16.mxu1 %v610_v12  ;;  %v617_v24 = vld [vmem:[%s831_s0 + $0x24] ss:$8 sps:$4 sm:$0xff]   ;;  %v621_v26 = vld [vmem:[%s831_s0 + $0x20] ss:$8 sps:$4 sm:$0xff]   ;;  %v623_v28 = vld [vmem:[%s831_s0 + $0x34] ss:$8 sps:$4 sm:$0xff]  }
   0xa   :  { %v619_v25 = vld [vmem:[%s831_s0 + $0x64] ss:$8 sps:$4 sm:$0xff]   ;;  %v622_v27 = vld [vmem:[%s831_s0 + $0x60] ss:$8 sps:$4 sm:$0xff]   ;;  %v625_v29 = vld [vmem:[%s831_s0 + $0x74] ss:$8 sps:$4 sm:$0xff]  }
   0xb   :  { %514 = vmatpush3.bf16.msra.mxu0 %v594_v5  ;;  %583 = vmatpush3.bf16.msra.mxu1 %v594_v5  ;;  %v627_v30 = vld [vmem:[%s831_s0 + $0x30] ss:$8 sps:$4 sm:$0xff]   ;;  %v748_v34 = vld [vmem:[%s832_s2] ss:$0 sm:$0xff] }
   0xc   :  { %515 = vmatprep.subr.bf16.mxu0 %v595_v6  ;;  %576 = vmatprep.subr.bf16.mxu1 %v595_v6  ;;  %v628_v31 = vld [vmem:[%s831_s0 + $0x70] ss:$8 sps:$4 sm:$0xff]  }
   0xf   :  { %516 = vmatpush3.bf16.msra.mxu0 %v596_v7  ;;  %584 = vmatpush3.bf16.msra.mxu1 %v596_v7 }
  0x10   :  { %517 = vmatprep.subr.bf16.mxu0 %v597_v8  ;;  %577 = vmatprep.subr.bf16.mxu1 %v597_v8 }
  0x13   :  { %518 = vmatpush3.bf16.msra.mxu0 %v598_v9  ;;  %585 = vmatpush3.bf16.msra.mxu1 %v598_v9 }
  0x14   :  { %519 = vmatprep.subr.bf16.mxu0 %v599_v10  ;;  %578 = vmatprep.subr.bf16.mxu1 %v599_v10 }
  0x17   :  { %520 = vmatpush3.bf16.msra.mxu0 %v600_v13  ;;  %586 = vmatpush3.bf16.msra.mxu1 %v600_v13 }
  0x18   :  { %521 = vmatprep.subr.bf16.mxu0 %v601_v14  ;;  %579 = vmatprep.subr.bf16.mxu1 %v601_v14 }
  0x1b   :  { %522 = vmatpush3.bf16.msra.mxu0 %v602_v15  ;;  %587 = vmatpush3.bf16.msra.mxu1 %v602_v15 }
  0x1c   :  { %523 = vmatprep.subr.bf16.mxu0 %v603_v16  ;;  %580 = vmatprep.subr.bf16.mxu1 %v603_v16 }
  0x1f   :  { %524 = vmatpush3.bf16.msra.mxu0 %v604_v17  ;;  %588 = vmatpush3.bf16.msra.mxu1 %v604_v17 }
  0x22   :  { %279 = vmatmul.mubr.bf16.vlgmr.msra.gmra.mrb[0].mxu0 %v605_v18  ;;  %311 = vmatmul.mubr.bf16.vlgmr.msra.gmra.mrb[0].mxu1 %v608_v19 }
  0x23   :  { %286 = vmatprep.mubr.bf16.mxu0 %v611_v20  ;;  %318 = vmatprep.mubr.bf16.mxu1 %v613_v21 }
  0x2a   :  { %287 = vmatmul.mubr.bf16.gmra.mrb[4].mxu0 %v615_v22  ;;  %319 = vmatmul.mubr.bf16.gmra.mrb[4].mxu1 %v616_v23 }
  0x2b   :  { %294 = vmatprep.mubr.bf16.mxu0 %v617_v24  ;;  %326 = vmatprep.mubr.bf16.mxu1 %v619_v25 }
  0x32   :  { %295 = vmatmul.mubr.bf16.gmra.mrb[8].mxu0 %v621_v26  ;;  %327 = vmatmul.mubr.bf16.gmra.mrb[8].mxu1 %v622_v27 }
  0x33   :  { %302 = vmatprep.mubr.bf16.mxu0 %v623_v28  ;;  %334 = vmatprep.mubr.bf16.mxu1 %v625_v29 }
  0x3a   :  { %303 = vmatmul.mubr.bf16.gmra.mrb[12].mxu0 %v627_v30  ;;  %335 = vmatmul.mubr.bf16.gmra.mrb[12].mxu1 %v628_v31 }
  0xf5   :  { %v525_v32 = vpop.f32.mrb[0].mxu0  ;;  %v549_v33 = vpop.f32.mrb[0].mxu1 }
  0xf6   :  { %v526_v35 = vpop.f32.mrb[1].mxu0  ;;  %v550_v36 = vpop.f32.mrb[1].mxu1 }
  0xf7   :  { %v527_v37 = vadd.f32 %v526_v35, %v525_v32  ;;  %v551_v38 = vadd.f32 %v550_v36, %v549_v33  ;;  %v528_v39 = vpop.f32.mrb[2].mxu0  ;;  %v552_v40 = vpop.f32.mrb[2].mxu1 }
  0xf8   :  { %v529_v41 = vpop.f32.mrb[3].mxu0  ;;  %v553_v42 = vpop.f32.mrb[3].mxu1 }
  0xf9   :  { %v281_v43 = vadd.f32 %v527_v37, %v748_v34  ;;  %v313_v44 = vadd.f32 %v551_v38, %v748_v34  ;;  %v530_v45 = vadd.f32 %v529_v41, %v528_v39  ;;  %v554_v46 = vadd.f32 %v553_v42, %v552_v40 }
  0xfb   :  { %v343_v47 = vmax.f32 %v281_v43, 0.0  ;;  %v351_v48 = vmax.f32 %v313_v44, 0.0  ;;  %v284_v49 = vadd.f32 %v530_v45, %v748_v34  ;;  %v316_v50 = vadd.f32 %v554_v46, %v748_v34 }
  0xfd   :  { %v493_v51 = vpack.c.bf16 %v343_v47, %v343_v47  ;;  %v501_v52 = vpack.c.bf16 %v351_v48, %v351_v48  ;;  %v344_v53 = vmax.f32 %v284_v49, 0.0  ;;  %v352_v54 = vmax.f32 %v316_v50, 0.0  ;;  %v531_v55 = vpop.f32.mrb[4].mxu0  ;;  %v555_v56 = vpop.f32.mrb[4].mxu1 }
  0xfe   :  { %v532_v57 = vpop.f32.mrb[5].mxu0  ;;  %v556_v58 = vpop.f32.mrb[5].mxu1 }
  0xff   :  { %424 = vst.msk [vmem:[%s833_s3] sm:$0xf] %vm423_vm0, %v493_v51  ;;  %432 = vst.msk [vmem:[%s833_s3 + $0x20] sm:$0xf] %vm423_vm0, %v501_v52  ;;  %v494_v59 = vpack.c.bf16 %v344_v53, %v344_v53  ;;  %v502_v60 = vpack.c.bf16 %v352_v54, %v352_v54  ;;  %v533_v61 = vadd.f32 %v532_v57, %v531_v55  ;;  %v534_v63 = vpop.f32.mrb[6].mxu0  ;;  %v558_v0 = vpop.f32.mrb[6].mxu1 }
 0x100   :  { %v557_v62 = vadd.f32 %v556_v58, %v555_v56  ;;  %v535_v1 = vpop.f32.mrb[7].mxu0  ;;  %v559_v2 = vpop.f32.mrb[7].mxu1 }
 0x101   :  { %425 = vst.msk [vmem:[%s833_s3 + $0x4] sm:$0xf] %vm423_vm0, %v494_v59  ;;  %433 = vst.msk [vmem:[%s833_s3 + $0x24] sm:$0xf] %vm423_vm0, %v502_v60  ;;  %v289_v3 = vadd.f32 %v533_v61, %v748_v34  ;;  %v536_v5 = vadd.f32 %v535_v1, %v534_v63  ;;  %v560_v6 = vadd.f32 %v559_v2, %v558_v0 }
 0x102   :  { %v321_v4 = vadd.f32 %v557_v62, %v748_v34 }
 0x103   :  { %v345_v7 = vmax.f32 %v289_v3, 0.0  ;;  %v292_v9 = vadd.f32 %v536_v5, %v748_v34  ;;  %v324_v10 = vadd.f32 %v560_v6, %v748_v34 }
 0x104   :  { %v353_v8 = vmax.f32 %v321_v4, 0.0 }
 0x105   :  { %v495_v11 = vpack.c.bf16 %v345_v7, %v345_v7  ;;  %v346_v13 = vmax.f32 %v292_v9, 0.0  ;;  %v354_v14 = vmax.f32 %v324_v10, 0.0  ;;  %v537_v15 = vpop.f32.mrb[8].mxu0  ;;  %v561_v16 = vpop.f32.mrb[8].mxu1 }
 0x106   :  { %v503_v12 = vpack.c.bf16 %v353_v8, %v353_v8  ;;  %v538_v17 = vpop.f32.mrb[9].mxu0  ;;  %v562_v18 = vpop.f32.mrb[9].mxu1 }
 0x107   :  { %426 = vst.msk [vmem:[%s833_s3 + $0x8] sm:$0xf] %vm423_vm0, %v495_v11  ;;  %v496_v19 = vpack.c.bf16 %v346_v13, %v346_v13  ;;  %v504_v20 = vpack.c.bf16 %v354_v14, %v354_v14  ;;  %v539_v21 = vadd.f32 %v538_v17, %v537_v15  ;;  %v563_v22 = vadd.f32 %v562_v18, %v561_v16  ;;  %v540_v23 = vpop.f32.mrb[10].mxu0  ;;  %v564_v24 = vpop.f32.mrb[10].mxu1 }
 0x108   :  { %434 = vst.msk [vmem:[%s833_s3 + $0x28] sm:$0xf] %vm423_vm0, %v503_v12  ;;  %v541_v25 = vpop.f32.mrb[11].mxu0  ;;  %v565_v26 = vpop.f32.mrb[11].mxu1 }
 0x109   :  { %427 = vst.msk [vmem:[%s833_s3 + $0xc] sm:$0xf] %vm423_vm0, %v496_v19  ;;  %435 = vst.msk [vmem:[%s833_s3 + $0x2c] sm:$0xf] %vm423_vm0, %v504_v20  ;;  %v297_v27 = vadd.f32 %v539_v21, %v748_v34  ;;  %v329_v28 = vadd.f32 %v563_v22, %v748_v34  ;;  %v542_v29 = vadd.f32 %v541_v25, %v540_v23 }
 0x10a   :  { %v566_v30 = vadd.f32 %v565_v26, %v564_v24 }
 0x10b   :  { %v347_v31 = vmax.f32 %v297_v27, 0.0  ;;  %v355_v32 = vmax.f32 %v329_v28, 0.0  ;;  %v300_v33 = vadd.f32 %v542_v29, %v748_v34 }
 0x10c   :  { %v332_v35 = vadd.f32 %v566_v30, %v748_v34 }
 0x10d   :  { %v497_v36 = vpack.c.bf16 %v347_v31, %v347_v31  ;;  %v505_v37 = vpack.c.bf16 %v355_v32, %v355_v32  ;;  %v348_v38 = vmax.f32 %v300_v33, 0.0  ;;  %v543_v40 = vpop.f32.mrb[12].mxu0  ;;  %v567_v41 = vpop.f32.mrb[12].mxu1 }
 0x10e   :  { %v356_v39 = vmax.f32 %v332_v35, 0.0  ;;  %v544_v42 = vpop.f32.mrb[13].mxu0  ;;  %v568_v43 = vpop.f32.mrb[13].mxu1 }
 0x10f   :  { %428 = vst.msk [vmem:[%s833_s3 + $0x10] sm:$0xf] %vm423_vm0, %v497_v36  ;;  %436 = vst.msk [vmem:[%s833_s3 + $0x30] sm:$0xf] %vm423_vm0, %v505_v37  ;;  %v498_v44 = vpack.c.bf16 %v348_v38, %v348_v38  ;;  %v545_v46 = vadd.f32 %v544_v42, %v543_v40  ;;  %v569_v47 = vadd.f32 %v568_v43, %v567_v41  ;;  %v546_v48 = vpop.f32.mrb[14].mxu0  ;;  %v570_v49 = vpop.f32.mrb[14].mxu1 }
 0x110   :  { %v506_v45 = vpack.c.bf16 %v356_v39, %v356_v39  ;;  %v547_v50 = vpop.f32.mrb[15].mxu0  ;;  %v571_v51 = vpop.f32.mrb[15].mxu1 }
 0x111   :  { %429 = vst.msk [vmem:[%s833_s3 + $0x14] sm:$0xf] %vm423_vm0, %v498_v44  ;;  %v305_v52 = vadd.f32 %v545_v46, %v748_v34  ;;  %v337_v53 = vadd.f32 %v569_v47, %v748_v34  ;;  %v548_v54 = vadd.f32 %v547_v50, %v546_v48  ;;  %v572_v55 = vadd.f32 %v571_v51, %v570_v49 }
 0x112   :  { %437 = vst.msk [vmem:[%s833_s3 + $0x34] sm:$0xf] %vm423_vm0, %v506_v45 }
 0x113   :  { %v349_v56 = vmax.f32 %v305_v52, 0.0  ;;  %v357_v57 = vmax.f32 %v337_v53, 0.0  ;;  %v308_v58 = vadd.f32 %v548_v54, %v748_v34  ;;  %v340_v59 = vadd.f32 %v572_v55, %v748_v34 }
 0x115   :  { %v499_v60 = vpack.c.bf16 %v349_v56, %v349_v56  ;;  %v507_v61 = vpack.c.bf16 %v357_v57, %v357_v57  ;;  %v350_v62 = vmax.f32 %v308_v58, 0.0  ;;  %v358_v63 = vmax.f32 %v340_v59, 0.0 }
 0x117   :  { %430 = vst.msk [vmem:[%s833_s3 + $0x18] sm:$0xf] %vm423_vm0, %v499_v60  ;;  %438 = vst.msk [vmem:[%s833_s3 + $0x38] sm:$0xf] %vm423_vm0, %v507_v61  ;;  %v500_v0 = vpack.c.bf16 %v350_v62, %v350_v62  ;;  %v508_v1 = vpack.c.bf16 %v358_v63, %v358_v63 }
 0x119   :  { %431 = vst.msk [vmem:[%s833_s3 + $0x1c] sm:$0xf] %vm423_vm0, %v500_v0  ;;  %439 = vst.msk [vmem:[%s833_s3 + $0x3c] sm:$0xf] %vm423_vm0, %v508_v1 }

// kernel: fsadqn_forward.6
= control target key start
LH: loop header
LB: loop body
LE: loop exit
PB: predicated region body
PF: predicated region fallthrough
CT: control target
= control target key end

     0   :  { %vm430_vm0 = vcmask 519168   ;;  %vm433_vm1 = vcmask 516096   ;;  %s730_s1 = inlined_call_operand.vmem [shape: bf16[512,64], index: 1, kind: input, shape index: {}]   ;;  %s731_s0 = inlined_call_operand.vmem [shape: bf16[18,512], index: 0, kind: input, shape index: {}]   ;;  %s732_s2 = inlined_call_operand.vmem [shape: f32[1,64], index: 2, kind: input, shape index: {}]   ;;  %s733_s3 = inlined_call_operand.vmem [shape: bf16[18,64], index: 3, kind: output, shape index: {}]  }
   0x1   :  { %v542_v0 = vld [vmem:[%s730_s1 + $0x40] sm:$0xff]   ;;  %v546_v4 = vld [vmem:[%s730_s1 + $0x48] sm:$0xff]   ;;  %v550_v8 = vld [vmem:[%s730_s1 + $0x50] sm:$0xff]  }
   0x2   :  { %v543_v1 = vld [vmem:[%s730_s1 + $0xc0] sm:$0xff]   ;;  %486 = vmatprep.subr.bf16.mxu0 %v542_v0  ;;  %v547_v5 = vld [vmem:[%s730_s1 + $0xc8] sm:$0xff]   ;;  %v551_v9 = vld [vmem:[%s730_s1 + $0xd0] sm:$0xff]  }
   0x3   :  { %v544_v2 = vld [vmem:[%s730_s1] sm:$0xff]   ;;  %514 = vmatprep.subr.bf16.mxu1 %v543_v1  ;;  %v548_v6 = vld [vmem:[%s730_s1 + $0x8] sm:$0xff]   ;;  %v552_v10 = vld [vmem:[%s730_s1 + $0x10] sm:$0xff]  }
   0x4   :  { %v545_v3 = vld [vmem:[%s730_s1 + $0x80] sm:$0xff]   ;;  %487 = vmatpush3.bf16.msra.mxu0 %v544_v2  ;;  %v549_v7 = vld [vmem:[%s730_s1 + $0x88] sm:$0xff]   ;;  %v553_v11 = vld [vmem:[%s730_s1 + $0x90] sm:$0xff]  }
   0x5   :  { %515 = vmatpush3.bf16.msra.mxu1 %v545_v3  ;;  %488 = vmatprep.subr.bf16.mxu0 %v546_v4  ;;  %v554_v12 = vld [vmem:[%s730_s1 + $0x58] sm:$0xff]   ;;  %v558_v16 = vld [vmem:[%s730_s1 + $0x60] sm:$0xff]   ;;  %v562_v20 = vld [vmem:[%s730_s1 + $0x68] sm:$0xff]  }
   0x6   :  { %516 = vmatprep.subr.bf16.mxu1 %v547_v5  ;;  %v555_v13 = vld [vmem:[%s730_s1 + $0xd8] sm:$0xff]   ;;  %v559_v17 = vld [vmem:[%s730_s1 + $0xe0] sm:$0xff]   ;;  %v563_v21 = vld [vmem:[%s730_s1 + $0xe8] sm:$0xff]  }
   0x7   :  { %v556_v14 = vld [vmem:[%s730_s1 + $0x18] sm:$0xff]   ;;  %v560_v18 = vld [vmem:[%s730_s1 + $0x20] sm:$0xff]   ;;  %v564_v22 = vld [vmem:[%s730_s1 + $0x28] sm:$0xff]  }
   0x8   :  { %489 = vmatpush3.bf16.msra.mxu0 %v548_v6  ;;  %v557_v15 = vld [vmem:[%s730_s1 + $0x98] sm:$0xff]   ;;  %v561_v19 = vld [vmem:[%s730_s1 + $0xa0] sm:$0xff]   ;;  %v565_v23 = vld [vmem:[%s730_s1 + $0xa8] sm:$0xff]  }
   0x9   :  { %517 = vmatpush3.bf16.msra.mxu1 %v549_v7  ;;  %490 = vmatprep.subr.bf16.mxu0 %v550_v8  ;;  %v566_v24 = vld [vmem:[%s730_s1 + $0x70] sm:$0xff]   ;;  %v570_v28 = vld [vmem:[%s730_s1 + $0x78] sm:$0xff]   ;;  %v19_v36 = vld [vmem:[%s731_s0 + $0x20] sm:$0x11] }
   0xa   :  { %518 = vmatprep.subr.bf16.mxu1 %v551_v9  ;;  %v567_v25 = vld [vmem:[%s730_s1 + $0xf0] sm:$0xff]   ;;  %v571_v29 = vld [vmem:[%s730_s1 + $0xf8] sm:$0xff]   ;;  %v445_v37 = vcombine.high %v19_v36, %v19_v36  ;;  %v20_v38 = vld [vmem:[%s731_s0 + $0x28] sm:$0x11]  ;;  %v444_v40 = vcombine.low %v19_v36, %v19_v36 }
   0xb   :  { %v568_v26 = vld [vmem:[%s730_s1 + $0x30] sm:$0xff]   ;;  %v572_v30 = vld [vmem:[%s730_s1 + $0x38] sm:$0xff]   ;;  %v447_v39 = vcombine.high %v20_v38, %v20_v38  ;;  %v446_v41 = vcombine.low %v20_v38, %v20_v38  ;;  %v439_v44 = vld [vmem:[%s732_s2] ss:$0 sm:$0xff] }
   0xc   :  { %491 = vmatpush3.bf16.msra.mxu0 %v552_v10  ;;  %v569_v27 = vld [vmem:[%s730_s1 + $0xb0] sm:$0xff]   ;;  %v573_v31 = vld [vmem:[%s730_s1 + $0xb8] sm:$0xff]  }
   0xd   :  { %519 = vmatpush3.bf16.msra.mxu1 %v553_v11  ;;  %492 = vmatprep.subr.bf16.mxu0 %v554_v12  ;;  %v574_v32 = vld [vmem:[%s731_s0] ss:$16 sps:$4 sm:$0xff]   ;;  %v576_v33 = vld [vmem:[%s731_s0 + $0x4] ss:$16 sps:$4 sm:$0xff]   ;;  %v577_v34 = vld [vmem:[%s731_s0 + $0x8] ss:$16 sps:$4 sm:$0xff]  }
   0xe   :  { %520 = vmatprep.subr.bf16.mxu1 %v555_v13  ;;  %v579_v35 = vld [vmem:[%s731_s0 + $0xc] ss:$16 sps:$4 sm:$0xff]   ;;  %350 = vmatprep.mubr.bf16.mxu0 %v576_v33 }
   0xf   :  { %398 = vmatprep.mubr.bf16.mxu1 %v579_v35 }
  0x10   :  { %493 = vmatpush3.bf16.msra.mxu0 %v556_v14 }
  0x11   :  { %521 = vmatpush3.bf16.msra.mxu1 %v557_v15  ;;  %494 = vmatprep.subr.bf16.mxu0 %v558_v16 }
  0x12   :  { %522 = vmatprep.subr.bf16.mxu1 %v559_v17 }
  0x14   :  { %495 = vmatpush3.bf16.msra.mxu0 %v560_v18 }
  0x15   :  { %523 = vmatpush3.bf16.msra.mxu1 %v561_v19  ;;  %496 = vmatprep.subr.bf16.mxu0 %v562_v20 }
  0x16   :  { %524 = vmatprep.subr.bf16.mxu1 %v563_v21 }
  0x18   :  { %497 = vmatpush3.bf16.msra.mxu0 %v564_v22 }
  0x19   :  { %525 = vmatpush3.bf16.msra.mxu1 %v565_v23  ;;  %498 = vmatprep.subr.bf16.mxu0 %v566_v24 }
  0x1a   :  { %526 = vmatprep.subr.bf16.mxu1 %v567_v25 }
  0x1c   :  { %499 = vmatpush3.bf16.msra.mxu0 %v568_v26 }
  0x1d   :  { %527 = vmatpush3.bf16.msra.mxu1 %v569_v27  ;;  %500 = vmatprep.subr.bf16.mxu0 %v570_v28 }
  0x1e   :  { %528 = vmatprep.subr.bf16.mxu1 %v571_v29 }
  0x20   :  { %501 = vmatpush3.bf16.msra.mxu0 %v572_v30 }
  0x21   :  { %529 = vmatpush3.bf16.msra.mxu1 %v573_v31 }
  0x23   :  { %351 = vmatmul.mubr.bf16.vlgmr.msra.gmra.mrb[0].mxu0 %v574_v32 }
  0x24   :  { %399 = vmatmul.mubr.bf16.vlgmr.msra.gmra.mrb[0].mxu1 %v577_v34  ;;  %358 = vmatprep.mubr.bf16.mxu0 %v445_v37 }
  0x25   :  { %406 = vmatprep.mubr.bf16.mxu1 %v447_v39 }
  0x2b   :  { %359 = vmatmul.mubr.bf16.gmra.mrb[4].mxu0 %v444_v40 }
  0x2c   :  { %407 = vmatmul.mubr.bf16.gmra.mrb[4].mxu1 %v446_v41 }
  0xf6   :  { %v502_v42 = vpop.f32.mrb[0].mxu0 }
  0xf7   :  { %v530_v43 = vpop.f32.mrb[0].mxu1  ;;  %v503_v45 = vpop.f32.mrb[1].mxu0 }
  0xf8   :  { %v504_v46 = vadd.f32 %v503_v45, %v502_v42  ;;  %v531_v47 = vpop.f32.mrb[1].mxu1  ;;  %v505_v48 = vpop.f32.mrb[2].mxu0 }
  0xf9   :  { %v532_v49 = vadd.f32 %v531_v47, %v530_v43  ;;  %v533_v50 = vpop.f32.mrb[2].mxu1  ;;  %v506_v51 = vpop.f32.mrb[3].mxu0 }
  0xfa   :  { %v353_v52 = vadd.f32 %v504_v46, %v439_v44  ;;  %v507_v53 = vadd.f32 %v506_v51, %v505_v48  ;;  %v534_v54 = vpop.f32.mrb[3].mxu1 }
  0xfb   :  { %v535_v55 = vadd.f32 %v534_v54, %v533_v50 }
  0xfc   :  { %v401_v56 = vadd.f32 %v532_v49, %v353_v52  ;;  %v356_v57 = vadd.f32 %v507_v53, %v439_v44 }
  0xfe   :  { %v414_v58 = vmax.f32 %v401_v56, 0.0  ;;  %v404_v59 = vadd.f32 %v535_v55, %v356_v57  ;;  %v508_v60 = vpop.f32.mrb[4].mxu0 }
  0xff   :  { %v536_v61 = vpop.f32.mrb[4].mxu1  ;;  %v509_v62 = vpop.f32.mrb[5].mxu0 }
 0x100   :  { %v483_v63 = vpack.c.bf16 %v414_v58, %v414_v58  ;;  %v415_v0 = vmax.f32 %v404_v59, 0.0  ;;  %v510_v1 = vadd.f32 %v509_v62, %v508_v60  ;;  %v537_v2 = vpop.f32.mrb[5].mxu1  ;;  %v511_v3 = vpop.f32.mrb[6].mxu0 }
 0x101   :  { %v538_v4 = vadd.f32 %v537_v2, %v536_v61  ;;  %v539_v5 = vpop.f32.mrb[6].mxu1  ;;  %v512_v6 = vpop.f32.mrb[7].mxu0 }
 0x102   :  { %431 = vst.msk [vmem:[%s733_s3] sm:$0xf] %vm430_vm0, %v483_v63  ;;  %v484_v7 = vpack.c.bf16 %v415_v0, %v415_v0  ;;  %v361_v8 = vadd.f32 %v510_v1, %v439_v44  ;;  %v540_v9 = vpop.f32.mrb[7].mxu1 }
 0x104   :  { %432 = vst.msk [vmem:[%s733_s3 + $0x4] sm:$0xf] %vm430_vm0, %v484_v7  ;;  %v409_v10 = vadd.f32 %v538_v4, %v361_v8 }
 0x106   :  { %v416_v11 = vmax.f32 %v409_v10, 0.0 }
 0x108   :  { %v485_v12 = vpack.c.bf16 %v416_v11, %v416_v11 }
 0x10a   :  { %434 = vst.msk [vmem:[%s733_s3 + $0x8] sm:$0x1] %vm433_vm1, %v485_v12 }

// kernel: fsadqn_forward.7
= control target key start
LH: loop header
LB: loop body
LE: loop exit
PB: predicated region body
PF: predicated region fallthrough
CT: control target
= control target key end

     0   :  { %v625_v21 = vmov 1966171168   ;;  %v100_v23 = vlaneseq  ;;  %v626_v40 = vmov 0.0   ;;  %vm627_vm0 = vmmov 0   ;;  %s765_s1 = inlined_call_operand.vmem [shape: bf16[576,64], index: 1, kind: input, shape index: {}]   ;;  %s766_s0 = inlined_call_operand.vmem [shape: bf16[2,576], index: 0, kind: input, shape index: {}]   ;;  %s767_s2 = inlined_call_operand.vmem [shape: f32[1,64], index: 2, kind: input, shape index: {}]   ;;  %s768_s3 = inlined_call_operand.vmem [shape: f32[2,64], index: 3, kind: output, shape index: {}]  }
   0x1   :  { %v588_v0 = vld [vmem:[%s765_s1 + $0x40] sm:$0xff]   ;;  %v592_v4 = vld [vmem:[%s765_s1 + $0x48] sm:$0xff]   ;;  %v596_v8 = vld [vmem:[%s765_s1 + $0x50] sm:$0xff]   ;;  %v98_v22 = vunpack.c.l.s4 %v625_v21  ;;  %vm355_vm1 = vcmask 523264   ;;  %vm480_vm2 = vcmask 517120  }
   0x2   :  { %v589_v1 = vld [vmem:[%s765_s1] sm:$0xff]   ;;  %524 = vmatprep.subr.bf16.mxu0 %v588_v0  ;;  %v593_v5 = vld [vmem:[%s765_s1 + $0x8] sm:$0xff]   ;;  %v597_v9 = vld [vmem:[%s765_s1 + $0x10] sm:$0xff]   ;;  %v101_v29 = vshrl.u32 %v100_v23, 7 }
   0x3   :  { %v590_v2 = vld [vmem:[%s765_s1 + $0xc0] sm:$0xff]   ;;  %525 = vmatpush3.bf16.msra.mxu0 %v589_v1  ;;  %v594_v6 = vld [vmem:[%s765_s1 + $0xc8] sm:$0xff]   ;;  %v598_v10 = vld [vmem:[%s765_s1 + $0xd0] sm:$0xff]   ;;  %v99_v28 = vunpack.c.0.s8 %v98_v22 }
   0x4   :  { %v591_v3 = vld [vmem:[%s765_s1 + $0x80] sm:$0xff]   ;;  %546 = vmatprep.subr.bf16.mxu1 %v590_v2  ;;  %526 = vmatprep.subr.bf16.mxu0 %v592_v4  ;;  %v595_v7 = vld [vmem:[%s765_s1 + $0x88] sm:$0xff]   ;;  %v599_v11 = vld [vmem:[%s765_s1 + $0x90] sm:$0xff]  }
   0x5   :  { %547 = vmatpush3.bf16.msra.mxu1 %v591_v3  ;;  %v600_v12 = vld [vmem:[%s765_s1 + $0x58] sm:$0xff]   ;;  %v604_v16 = vld [vmem:[%s765_s1 + $0x60] sm:$0xff]   ;;  %v608_v20 = vld [vmem:[%s765_s1 + $0x68] sm:$0xff]   ;;  %v102_v34 = vsub.s32 %v99_v28, %v101_v29 }
   0x6   :  { %548 = vmatprep.subr.bf16.mxu1 %v594_v6  ;;  %v601_v13 = vld [vmem:[%s765_s1 + $0x18] sm:$0xff]   ;;  %v605_v17 = vld [vmem:[%s765_s1 + $0x20] sm:$0xff]   ;;  %v609_v24 = vld [vmem:[%s765_s1 + $0x28] sm:$0xff]  }
   0x7   :  { %527 = vmatpush3.bf16.msra.mxu0 %v593_v5  ;;  %v602_v14 = vld [vmem:[%s765_s1 + $0xd8] sm:$0xff]   ;;  %v606_v18 = vld [vmem:[%s765_s1 + $0xe0] sm:$0xff]   ;;  %v610_v25 = vld [vmem:[%s765_s1 + $0xe8] sm:$0xff]  }
   0x8   :  { %528 = vmatprep.subr.bf16.mxu0 %v596_v8  ;;  %v603_v15 = vld [vmem:[%s765_s1 + $0x98] sm:$0xff]   ;;  %v607_v19 = vld [vmem:[%s765_s1 + $0xa0] sm:$0xff]   ;;  %v611_v26 = vld [vmem:[%s765_s1 + $0xa8] sm:$0xff]  }
   0x9   :  { %549 = vmatpush3.bf16.msra.mxu1 %v595_v7  ;;  %v612_v27 = vld [vmem:[%s765_s1 + $0x70] sm:$0xff]   ;;  %v616_v33 = vld [vmem:[%s765_s1 + $0x78] sm:$0xff]   ;;  %v15_v37 = vld [vmem:[%s766_s0] sm:$0x1f] }
   0xa   :  { %550 = vmatprep.subr.bf16.mxu1 %v598_v10  ;;  %v613_v30 = vld [vmem:[%s765_s1 + $0x30] sm:$0xff]   ;;  %v617_v35 = vld [vmem:[%s765_s1 + $0x38] sm:$0xff]   ;;  %v103_v38 = vrot.slane %v15_v37, %v102_v34  ;;  %v621_v44 = vld [vmem:[%s765_s1 + $0x100] sm:$0xff]   ;;  %v96_v48 = vcombine.high %v15_v37, %v15_v37 }
   0xb   :  { %529 = vmatpush3.bf16.msra.mxu0 %v597_v9  ;;  %v614_v31 = vld [vmem:[%s765_s1 + $0xf0] sm:$0xff]   ;;  %v618_v36 = vld [vmem:[%s765_s1 + $0xf8] sm:$0xff]   ;;  %v622_v47 = vld [vmem:[%s765_s1 + $0x108] sm:$0xff]  }
   0xc   :  { %530 = vmatprep.subr.bf16.mxu0 %v600_v12  ;;  %v615_v32 = vld [vmem:[%s765_s1 + $0xb0] sm:$0xff]   ;;  %v620_v39 = vld [vmem:[%s765_s1 + $0xb8] sm:$0xff]   ;;  %v111_v41 = vcombine.high %v103_v38, %v103_v38  ;;  %v118_v42 = vrot.slane %v103_v38, %v102_v34  ;;  %v110_v50 = vrot.slane %v96_v48, %v102_v34  ;;  %v486_v54 = vld [vmem:[%s767_s2] ss:$0 sm:$0xff] }
   0xd   :  { %551 = vmatpush3.bf16.msra.mxu1 %v599_v11  ;;  %v623_v49 = vld [vmem:[%s765_s1 + $0x110] sm:$0xff]   ;;  %v624_v51 = vld [vmem:[%s765_s1 + $0x118] sm:$0xff]  }
   0xe   :  { %552 = vmatprep.subr.bf16.mxu1 %v602_v14  ;;  %v132_v43 = vrot.slane %v111_v41, %v102_v34  ;;  %v133_v45 = vcombine.high %v118_v42, %v118_v42  ;;  %v125_v52 = vrot.slane %v110_v50, %v102_v34 }
   0xf   :  { %531 = vmatpush3.bf16.msra.mxu0 %v601_v13 }
  0x10   :  { %532 = vmatprep.subr.bf16.mxu0 %v604_v16  ;;  %391 = vmatprep.mubr.bf16.mxu0 %v132_v43  ;;  %v134_v46 = vcombine.high %v132_v43, %v132_v43 }
  0x11   :  { %553 = vmatpush3.bf16.msra.mxu1 %v603_v15 }
  0x12   :  { %554 = vmatprep.subr.bf16.mxu1 %v606_v18  ;;  %431 = vmatprep.mubr.bf16.mxu1 %v134_v46 }
  0x13   :  { %533 = vmatpush3.bf16.msra.mxu0 %v605_v17 }
  0x14   :  { %534 = vmatprep.subr.bf16.mxu0 %v608_v20 }
  0x15   :  { %555 = vmatpush3.bf16.msra.mxu1 %v607_v19 }
  0x16   :  { %556 = vmatprep.subr.bf16.mxu1 %v610_v25 }
  0x17   :  { %535 = vmatpush3.bf16.msra.mxu0 %v609_v24 }
  0x18   :  { %536 = vmatprep.subr.bf16.mxu0 %v612_v27 }
  0x19   :  { %557 = vmatpush3.bf16.msra.mxu1 %v611_v26 }
  0x1a   :  { %558 = vmatprep.subr.bf16.mxu1 %v614_v31 }
  0x1b   :  { %537 = vmatpush3.bf16.msra.mxu0 %v613_v30 }
  0x1c   :  { %538 = vmatprep.subr.bf16.mxu0 %v616_v33 }
  0x1d   :  { %559 = vmatpush3.bf16.msra.mxu1 %v615_v32 }
  0x1e   :  { %560 = vmatprep.subr.bf16.mxu1 %v618_v36 }
  0x1f   :  { %539 = vmatpush3.bf16.msra.mxu0 %v617_v35 }
  0x20   :  { %573 = vmatprep.subr.bf16.mxu0 %v626_v40 }
  0x21   :  { %561 = vmatpush3.bf16.msra.mxu1 %v620_v39 }
  0x22   :  { %392 = vmatmul.mubr.bf16.vlgmr.msra.gmra.mrb[0].mxu0 %v118_v42 }
  0x23   :  { %574 = vmatpush3.bf16.msra.mxu0 %v621_v44  ;;  %581 = vmatprep.mubr.msk.bf16.mxu0 %vm627_vm0, %v626_v40 }
  0x24   :  { %432 = vmatmul.mubr.bf16.vlgmr.msra.gmra.mrb[0].mxu1 %v133_v45  ;;  %575 = vmatprep.subr.bf16.mxu0 %v626_v40 }
  0x27   :  { %576 = vmatpush3.bf16.msra.mxu0 %v622_v47 }
  0x28   :  { %577 = vmatprep.subr.bf16.mxu0 %v626_v40 }
  0x2b   :  { %578 = vmatpush3.bf16.msra.mxu0 %v623_v49 }
  0x2c   :  { %579 = vmatprep.subr.bf16.mxu0 %v626_v40 }
  0x2f   :  { %580 = vmatpush3.bf16.msra.mxu0 %v624_v51 }
  0x32   :  { %582 = vmatmul.mubr.msk.bf16.vlgmr.msra.gmra.mrb[4].mxu0 %vm355_vm1, %v125_v52 }
  0xf5   :  { %v540_v53 = vpop.f32.mrb[0].mxu0 }
  0xf6   :  { %v541_v55 = vpop.f32.mrb[1].mxu0 }
  0xf7   :  { %v542_v56 = vadd.f32 %v541_v55, %v540_v53  ;;  %v543_v57 = vpop.f32.mrb[2].mxu0  ;;  %v562_v58 = vpop.f32.mrb[0].mxu1 }
  0xf8   :  { %v544_v59 = vpop.f32.mrb[3].mxu0  ;;  %v563_v60 = vpop.f32.mrb[1].mxu1 }
  0xf9   :  { %v394_v61 = vadd.f32 %v542_v56, %v486_v54  ;;  %v564_v62 = vadd.f32 %v563_v60, %v562_v58  ;;  %v565_v63 = vpop.f32.mrb[2].mxu1 }
  0xfa   :  { %v566_v0 = vpop.f32.mrb[3].mxu1 }
  0xfb   :  { %v434_v1 = vadd.f32 %v564_v62, %v394_v61 }
 0x105   :  { %v473_v2 = vpop.f32.mrb[4].mxu0 }
 0x106   :  { %v474_v3 = vadd.f32 %v473_v2, %v434_v1  ;;  %v583_v4 = vpop.f32.mrb[5].mxu0 }
 0x107   :  { %v476_v5 = vpop.f32.mrb[6].mxu0 }
 0x108   :  { %v479_v6 = vmax.f32 %v474_v3, 0.0  ;;  %v584_v7 = vpop.f32.mrb[7].mxu0 }
 0x10a   :  { %481 = vst.msk [vmem:[%s768_s3] sm:$0x3] %vm480_vm2, %v479_v6 }

// kernel: fsadqn_forward.8
= control target key start
LH: loop header
LB: loop body
LE: loop exit
PB: predicated region body
PF: predicated region fallthrough
CT: control target
= control target key end

     0   :  { %vm39_vm0 = vcmask 1042432   ;;  %vm35_vm1 = vcmask 23552   ;;  %v313_v1 = vmov 0.0   ;;  %vm314_vm2 = vmmov 0   ;;  %s399_s0 = inlined_call_operand.vmem [shape: f32[2,3], index: 0, kind: input, shape index: {}]   ;;  %s400_s1 = inlined_call_operand.vmem [shape: f32[2,128], index: 1, kind: input, shape index: {}]   ;;  %s401_s2 = inlined_call_operand.vmem [shape: f32[3,32], index: 2, kind: input, shape index: {}]   ;;  %s402_s3 = inlined_call_operand.vmem [shape: f32[1,32], index: 3, kind: input, shape index: {}]   ;;  %s403_s4 = inlined_call_operand.vmem [shape: f32[32,128], index: 4, kind: input, shape index: {}]   ;;  %s404_s5 = inlined_call_operand.vmem [shape: f32[1,128], index: 5, kind: input, shape index: {}]   ;;  %s405_s6 = inlined_call_operand.vmem [shape: f32[2,128], index: 6, kind: output, shape index: {0}]   ;;  %s406_s7 = inlined_call_operand.hbm [shape: f32[1,1], index: 7, kind: output, shape index: {1}]  }
   0x1   :  { %v27_v0 = vld [vmem:[%s401_s2] sm:$0x7]  ;;  %263 = vmatprep.subr.mxu0 %v313_v1  ;;  %265 = vmatprep.mubr.msk.f32.mxu0 %vm314_vm2, %v313_v1  ;;  %v114_v4 = vld [vmem:[%s403_s4 + $0x8] sm:$0xff]  ;;  %v315_v5 = vmov 0.0|0.0  }
   0x2   :  { %v26_v2 = vld [vmem:[%s399_s0] sm:$0x3]  ;;  %264 = vmatpush3.msk.msra.mxu0 %vm39_vm0, %v27_v0  ;;  %279 = vmatprep.subr.bf16.mxu1 %v315_v5 }
   0x3   :  { %v113_v3 = vld [vmem:[%s403_s4] sm:$0xff] }
   0x4   :  { %v280_v6 = vpack.c.bf16 %v114_v4, %v113_v3 }
   0x5   :  { %13 = vsyncpa [#allocation4], 0  ;;  %266 = vmatmul.mubr.msk.f32.vlgmr.msra.gmra.mrb[0].mxu0 %vm35_vm1, %v26_v2  ;;  %276 = vmatprep.mubr.msk.f32.mxu1 %vm314_vm2, %v313_v1  ;;  %v115_v7 = vld [vmem:[%s403_s4 + $0x10] sm:$0xff]  ;;  %v116_v8 = vld [vmem:[%s403_s4 + $0x18] sm:$0xff]  ;;  %vm124_vm3 = vcmask 261120   ;;  %vm202_vm4 = vcmask 1041408  }
   0x6   :  { %281 = vmatpush3.bf16.msra.mxu1 %v280_v6  ;;  %v283_v9 = vpack.c.bf16 %v116_v8, %v115_v7  ;;  %v251_v10 = vld [vmem:[%s402_s3] ss:$0 sm:$0xff]  ;;  %vm217_vm5 = vcmask 0  }
   0x7   :  { %282 = vmatprep.subr.bf16.mxu1 %v315_v5  ;;  %v254_v14 = vld [vmem:[%s404_s5] ss:$0 sm:$0xff] }
   0x8   :  { %v199_v16 = vld [vmem:[%s400_s1] sm:$0x3]  ;;  %s316_s1 = smov [#allocation3]  }
   0x9   :  { %s241_s3 = sshll.u32 %s316_s1, 4  ;;  %s242_s3 = int_to_ptr.vmem [resolvable:$true] %s241_s3 }
   0xa   :  { %284 = vmatpush3.bf16.msra.mxu1 %v283_v9  ;;  %s289_s5 = scalar_lea.vmem %s242_s3, 16  ;;  %p294_p1 = scmp.lt.s32.totalorder %s242_s3, %s242_s3 }
   0xb   :  { %p290_p0 = scmp.ne.s32.totalorder %s242_s3, %s289_s5 }
  0xd8   :  { %v109_v11 = vpop.f32.mrb[0].mxu0 }
  0xd9   :  { %v110_v12 = vadd.f32 %v251_v10, %v109_v11  ;;  %v267_v13 = vpop.f32.mrb[1].mxu0 }
  0xdb   :  { %277 = vmatmul.mubr.msk.f32.vlgmr.msra.gmra.mrb[0].mxu1 %vm124_vm3, %v110_v12 }
 0x1ae   :  { %v194_v15 = vpop.f32.mrb[0].mxu1 }
 0x1af   :  { %v195_v17 = vadd.f32 %v254_v14, %v194_v15  ;;  %v278_v18 = vpop.f32.mrb[1].mxu1 }
 0x1b1   :  { %198 = vst [vmem:[%s405_s6] sm:$0x3] %v195_v17  ;;  %v200_v19 = vsub.f32 %v199_v16, %v195_v17  ;;  %s293_s6 = scalar_lea.vmem %s242_s3, 32 }
 0x1b2   :  { %p295_p2 = scmp.lt.s32.totalorder %s293_s6, %s289_s5 }
 0x1b3   :  { %v201_v20 = vand.u32 2147483647, %v200_v19 }
 0x1b4   :  { %p296_p3 = por %p295_p2, %p294_p1 }
 0x1b5   :  { %v203_v21 = vsel %vm202_vm4, %v201_v20, -inf }
 0x1b6   :  { %204 = vmax.xlane.f32.xlu0 %v203_v21  ;;  %p297_p4 = pnand %p296_p3, %p290_p0 }
 0x243   :  { %v205_v22 = vpop.xlane.xlu0 %204 }
 0x244   :  { %v206_v23 = vsel %vm202_vm4, %v205_v22, -inf }
 0x245   :  { %v207_v24 = vrot.slane %v206_v23, 4 }
 0x247   :  { %v208_v25 = vmax.f32 %v206_v23, %v207_v24 }
 0x249   :  { %v209_v26 = vrot.slane %v208_v25, 2 }
 0x24b   :  { %v210_v27 = vmax.f32 %v208_v25, %v209_v26 }
 0x24d   :  { %v211_v28 = vrot.slane %v210_v27, 1 }
 0x24f   :  { %v212_v29 = vmax.f32 %v210_v27, %v211_v28 }
 0x251   :  { %218 = vst.msk [vmem:[#allocation2] sm:$0x1] %vm217_vm5, %v212_v29 }
 0x258   :  { %v230_v30 = vld [vmem:[#allocation2] sm:$0x1] }
 0x259   :  { %232 = vst.msk [vmem:[#allocation3] sm:$0x1] %vm217_vm5, %v230_v30 }
 0x25a   :  { %300 = shalt.err (!%p297_p4)
}
 0x25b   :  { %s301_s20 = scalar_lea.hbm %s406_s7, 16 }
 0x25c   :  { %p302_p5 = scmp.ne.s32.totalorder %s406_s7, %s301_s20  ;;  %p305_p6 = scmp.lt.u32.totalorder %s301_s20, %s406_s7 }
 0x25e   :  { %p307_p7 = pnand %p305_p6, %p302_p5 }
 0x260   :  { %310 = shalt.err (!%p307_p7)
}
 0x261   :  { %244 = dma.vmem_to_hbm [thread:$0]  %s242_s3, 16, %s406_s7, [#allocation4]  }
 0x262   :  { %311 = dma.done.wait [#allocation4], 16  }
 0x263   :  { %312 = vsyncadd [#allocation4], 4294967280 }
 0x264   :  { %250 = vsyncpa [#allocation4], 1 }

// kernel: fsadqn_forward.9
= control target key start
LH: loop header
LB: loop body
LE: loop exit
PB: predicated region body
PF: predicated region fallthrough
CT: control target
= control target key end

     0   :  { %s1449_s0 = inlined_call_operand.vmem [shape: f32[2,128], index: 0, kind: input, shape index: {}]   ;;  %s1450_s1 = inlined_call_operand.vmem [shape: f32[2,128], index: 1, kind: input, shape index: {}]   ;;  %s1451_s2 = inlined_call_operand.vmem [shape: f32[2,3], index: 2, kind: input, shape index: {}]   ;;  %s1452_s3 = inlined_call_operand.<no memory space> [shape: f32[1,1], index: 3, kind: input, shape index: {}]   ;;  %s1453_s4 = inlined_call_operand.vmem [shape: bf16[128,512], index: 4, kind: input, shape index: {}]   ;;  %s1454_s5 = inlined_call_operand.vmem [shape: f32[1,512], index: 5, kind: input, shape index: {}]   ;;  %s1455_s6 = inlined_call_operand.vmem [shape: bf16[512,12], index: 6, kind: input, shape index: {}]   ;;  %s1456_s7 = inlined_call_operand.vmem [shape: f32[1,12], index: 7, kind: input, shape index: {}]   ;;  %s1457_s8 = inlined_call_operand.vmem [shape: f32[12,128], index: 8, kind: input, shape index: {}]   ;;  %s1458_s9 = inlined_call_operand.vmem [shape: f32[3,128], index: 9, kind: input, shape index: {}]   ;;  %s1459_s10 = inlined_call_operand.vmem [shape: f32[1,128], index: 10, kind: input, shape index: {}]   ;;  %s1460_s11 = inlined_call_operand.hbm [shape: f32[2,128], index: 11, kind: output, shape index: {}]  }
   0x1   :  { %v16_v0 = vstv %s1452_s3 }
   0x2   :  { %17 = vst [vmem:[#allocation2] sm:$0x1] %v16_v0 }
   0x3   :  { %v50_v2 = vlaneseq  ;;  %v1139_v3 = vmov 0   ;;  %v1033_v4 = vld [vmem:[%s1453_s4 + $0x4] ss:$16 sps:$4 sm:$0xff]   ;;  %v1035_v5 = vld [vmem:[%s1453_s4 + $0xc] ss:$16 sps:$4 sm:$0xff]  }
   0x4   :  { %1032 = vset.pattern.permute.xlu0 %v1139_v3  ;;  %306 = vmatprep.mubr.bf16.mxu0 %v1139_v3  ;;  %v1037_v6 = vld [vmem:[%s1453_s4] ss:$16 sps:$4 sm:$0xff]   ;;  %v1038_v7 = vld [vmem:[%s1453_s4 + $0x8] ss:$16 sps:$4 sm:$0xff]   ;;  %v1039_v8 = vld [vmem:[%s1453_s4 + $0x24] ss:$16 sps:$4 sm:$0xff]  }
   0x5   :  { %347 = vmatprep.mubr.bf16.mxu1 %v1139_v3  ;;  %274 = vmatprep.subr.bf16.mxu0 %v1033_v4  ;;  %v1223_v9 = vshrl.u32 %v50_v2, 7  ;;  %v1041_v10 = vld [vmem:[%s1453_s4 + $0x2c] ss:$16 sps:$4 sm:$0xff]   ;;  %v1043_v11 = vld [vmem:[%s1453_s4 + $0x20] ss:$16 sps:$4 sm:$0xff]  }
   0x6   :  { %315 = vmatprep.subr.bf16.mxu1 %v1035_v5  ;;  %275 = vmatpush1.bf16.msra.mxu0 %v1037_v6  ;;  %v1044_v12 = vld [vmem:[%s1453_s4 + $0x28] ss:$16 sps:$4 sm:$0xff]   ;;  %v1045_v13 = vld [vmem:[%s1453_s4 + $0x44] ss:$16 sps:$4 sm:$0xff]   ;;  %v1047_v14 = vld [vmem:[%s1453_s4 + $0x4c] ss:$16 sps:$4 sm:$0xff]  }
   0x7   :  { %316 = vmatpush1.bf16.msra.mxu1 %v1038_v7  ;;  %276 = vmatprep.subr.bf16.mxu0 %v1039_v8  ;;  %v1049_v15 = vld [vmem:[%s1453_s4 + $0x40] ss:$16 sps:$4 sm:$0xff]   ;;  %v52_v16 = vsub.s32 0, %v1223_v9  ;;  %v1050_v17 = vld [vmem:[%s1453_s4 + $0x48] ss:$16 sps:$4 sm:$0xff]  }
   0x8   :  { %317 = vmatprep.subr.bf16.mxu1 %v1041_v10  ;;  %v1051_v18 = vld [vmem:[%s1453_s4 + $0x64] ss:$16 sps:$4 sm:$0xff]   ;;  %v1053_v19 = vld [vmem:[%s1453_s4 + $0x6c] ss:$16 sps:$4 sm:$0xff]   ;;  %v1055_v22 = vld [vmem:[%s1453_s4 + $0x60] ss:$16 sps:$4 sm:$0xff]  }
   0x9   :  { %v46_v1 = vld [vmem:[#allocation2] sm:$0x1]  ;;  %v1056_v23 = vld [vmem:[%s1453_s4 + $0x68] ss:$16 sps:$4 sm:$0xff]   ;;  %v1057_v24 = vld [vmem:[%s1453_s4 + $0x84] ss:$16 sps:$4 sm:$0xff]  }
   0xa   :  { %1113 = vrcp.f32 %v46_v1  ;;  %277 = vmatpush1.bf16.msra.mxu0 %v1043_v11  ;;  %v1059_v25 = vld [vmem:[%s1453_s4 + $0x8c] ss:$16 sps:$4 sm:$0xff]   ;;  %v1061_v26 = vld [vmem:[%s1453_s4 + $0x80] ss:$16 sps:$4 sm:$0xff]   ;;  %v1062_v27 = vld [vmem:[%s1453_s4 + $0x88] ss:$16 sps:$4 sm:$0xff]  }
   0xb   :  { %318 = vmatpush1.bf16.msra.mxu1 %v1044_v12  ;;  %278 = vmatprep.subr.bf16.mxu0 %v1045_v13  ;;  %v1063_v28 = vld [vmem:[%s1453_s4 + $0xa4] ss:$16 sps:$4 sm:$0xff]   ;;  %v1065_v29 = vld [vmem:[%s1453_s4 + $0xac] ss:$16 sps:$4 sm:$0xff]   ;;  %v1067_v30 = vld [vmem:[%s1453_s4 + $0xa0] ss:$16 sps:$4 sm:$0xff]  }
   0xc   :  { %319 = vmatprep.subr.bf16.mxu1 %v1047_v14  ;;  %v1068_v31 = vld [vmem:[%s1453_s4 + $0xa8] ss:$16 sps:$4 sm:$0xff]   ;;  %v1069_v32 = vld [vmem:[%s1453_s4 + $0xc4] ss:$16 sps:$4 sm:$0xff]   ;;  %v1071_v33 = vld [vmem:[%s1453_s4 + $0xcc] ss:$16 sps:$4 sm:$0xff]  }
   0xd   :  { %v1073_v34 = vld [vmem:[%s1453_s4 + $0xc0] ss:$16 sps:$4 sm:$0xff]   ;;  %v1074_v35 = vld [vmem:[%s1453_s4 + $0xc8] ss:$16 sps:$4 sm:$0xff]   ;;  %v1075_v36 = vld [vmem:[%s1453_s4 + $0xe4] ss:$16 sps:$4 sm:$0xff]  }
   0xe   :  { %279 = vmatpush1.bf16.msra.mxu0 %v1049_v15  ;;  %v1077_v37 = vld [vmem:[%s1453_s4 + $0xec] ss:$16 sps:$4 sm:$0xff]   ;;  %v1079_v38 = vld [vmem:[%s1453_s4 + $0xe0] ss:$16 sps:$4 sm:$0xff]   ;;  %v1080_v39 = vld [vmem:[%s1453_s4 + $0xe8] ss:$16 sps:$4 sm:$0xff]  }
   0xf   :  { %320 = vmatpush1.bf16.msra.mxu1 %v1050_v17  ;;  %280 = vmatprep.subr.bf16.mxu0 %v1051_v18  ;;  %v1081_v40 = vld [vmem:[%s1455_s6 + $0x40] sm:$0xff]  }
  0x10   :  { %321 = vmatprep.subr.bf16.mxu1 %v1053_v19  ;;  %v1082_v41 = vld [vmem:[%s1455_s6 + $0xc0] sm:$0xff]  }
  0x12   :  { %281 = vmatpush1.bf16.msra.mxu0 %v1055_v22 }
  0x13   :  { %322 = vmatpush1.bf16.msra.mxu1 %v1056_v23  ;;  %282 = vmatprep.subr.bf16.mxu0 %v1057_v24 }
  0x14   :  { %v1114_v20 = vpop.eup %1113  ;;  %323 = vmatprep.subr.bf16.mxu1 %v1059_v25 }
  0x15   :  { %v53_v21 = vrot.slane %v1114_v20, %v52_v16 }
  0x16   :  { %283 = vmatpush1.bf16.msra.mxu0 %v1061_v26 }
  0x17   :  { %55 = vperm.xlu0 %1032, %v53_v21   ;;  %324 = vmatpush1.bf16.msra.mxu1 %v1062_v27 }
  0x18   :  { %284 = vmatprep.subr.bf16.mxu0 %v1063_v28  ;;  %325 = vmatprep.subr.bf16.mxu1 %v1065_v29 }
  0x1a   :  { %285 = vmatpush1.bf16.msra.mxu0 %v1067_v30 }
  0x1b   :  { %326 = vmatpush1.bf16.msra.mxu1 %v1068_v31  ;;  %286 = vmatprep.subr.bf16.mxu0 %v1069_v32 }
  0x1c   :  { %327 = vmatprep.subr.bf16.mxu1 %v1071_v33 }
  0x1e   :  { %287 = vmatpush1.bf16.msra.mxu0 %v1073_v34 }
  0x1f   :  { %328 = vmatpush1.bf16.msra.mxu1 %v1074_v35  ;;  %288 = vmatprep.subr.bf16.mxu0 %v1075_v36 }
  0x20   :  { %329 = vmatprep.subr.bf16.mxu1 %v1077_v37 }
  0x22   :  { %289 = vmatpush1.bf16.msra.mxu0 %v1079_v38 }
  0x23   :  { %330 = vmatpush1.bf16.msra.mxu1 %v1080_v39  ;;  %961 = vmatprep.subr.bf16.mxu0 %v1081_v40 }
  0x24   :  { %983 = vmatprep.subr.bf16.mxu1 %v1082_v41 }
  0x25   :  { %18 = vsyncpa [#allocation4], 0  ;;  %v42_v42 = vld [vmem:[%s1449_s0] sm:$0x3]  ;;  %v1085_v52 = vld [vmem:[%s1455_s6 + $0x48] sm:$0xff]   ;;  %v104_v18 = vsub.s32 2, %v1223_v9 }
  0x26   :  { %v43_v43 = vld [vmem:[%s1450_s1] sm:$0x3]  ;;  %v1086_v53 = vld [vmem:[%s1455_s6 + $0xc8] sm:$0xff]   ;;  %v1089_v56 = vld [vmem:[%s1455_s6 + $0x50] sm:$0xff]   ;;  %v100_v20 = vsub.s32 1, %v1223_v9  ;;  %v108_v21 = vsub.s32 3, %v1223_v9 }
  0x27   :  { %v44_v44 = vsub.f32 %v42_v42, %v43_v43  ;;  %v1083_v49 = vld [vmem:[%s1455_s6] sm:$0xff]   ;;  %v1087_v54 = vld [vmem:[%s1455_s6 + $0x8] sm:$0xff]   ;;  %v1090_v57 = vld [vmem:[%s1455_s6 + $0xd0] sm:$0xff]   ;;  %vm794_vm0 = vcmask 1043456   ;;  %vm1141_vm1 = vmmov 1   ;;  %vm716_vm3 = vcmask 1042432  }
  0x28   :  { %v1084_v50 = vld [vmem:[%s1455_s6 + $0x80] sm:$0xff]   ;;  %v1088_v55 = vld [vmem:[%s1455_s6 + $0x88] sm:$0xff]   ;;  %v1091_v58 = vld [vmem:[%s1455_s6 + $0x10] sm:$0xff]   ;;  %vm1143_vm4 = vmmov 0   ;;  %vm712_vm5 = vcmask 23552   ;;  %vm790_vm6 = vcmask 97280  }
  0x29   :  { %v45_v45 = vand.u32 2147483647, %v44_v44  ;;  %v1092_v59 = vld [vmem:[%s1455_s6 + $0x90] sm:$0xff]   ;;  %v1093_v60 = vld [vmem:[%s1455_s6 + $0x58] sm:$0xff]   ;;  %v1097_v0 = vld [vmem:[%s1455_s6 + $0x60] sm:$0xff]  }
  0x2a   :  { %v1094_v61 = vld [vmem:[%s1455_s6 + $0xd8] sm:$0xff]   ;;  %v1098_v1 = vld [vmem:[%s1455_s6 + $0xe0] sm:$0xff]   ;;  %v1101_v4 = vld [vmem:[%s1455_s6 + $0x68] sm:$0xff]  }
  0x2b   :  { %v48_v46 = vmul.f32 %v45_v45, %v42_v42  ;;  %v1095_v62 = vld [vmem:[%s1455_s6 + $0x18] sm:$0xff]   ;;  %v1099_v2 = vld [vmem:[%s1455_s6 + $0x20] sm:$0xff]   ;;  %v1102_v5 = vld [vmem:[%s1455_s6 + $0xe8] sm:$0xff]  }
  0x2c   :  { %v1096_v63 = vld [vmem:[%s1455_s6 + $0x98] sm:$0xff]   ;;  %v1100_v3 = vld [vmem:[%s1455_s6 + $0xa0] sm:$0xff]   ;;  %v1103_v6 = vld [vmem:[%s1455_s6 + $0x28] sm:$0xff]  }
  0x2d   :  { %v1104_v7 = vld [vmem:[%s1455_s6 + $0xa8] sm:$0xff]   ;;  %v1105_v8 = vld [vmem:[%s1455_s6 + $0x70] sm:$0xff]   ;;  %v1109_v13 = vld [vmem:[%s1455_s6 + $0x78] sm:$0xff]  }
  0x2e   :  { %v1106_v10 = vld [vmem:[%s1455_s6 + $0xf0] sm:$0xff]   ;;  %v1110_v14 = vld [vmem:[%s1455_s6 + $0xf8] sm:$0xff]   ;;  %v92_v19 = vld [vmem:[%s1454_s5] sm:$0xf] }
  0x2f   :  { %v1107_v11 = vld [vmem:[%s1455_s6 + $0x30] sm:$0xff]   ;;  %v1111_v15 = vld [vmem:[%s1455_s6 + $0x38] sm:$0xff]   ;;  %v97_v22 = vrot.slane %v92_v19, %v52_v16  ;;  %v105_v23 = vrot.slane %v92_v19, %v104_v18  ;;  %v101_v24 = vrot.slane %v92_v19, %v100_v20  ;;  %v109_v25 = vrot.slane %v92_v19, %v108_v21  ;;  %v708_v44 = vld [vmem:[%s1457_s8] sm:$0xff] }
  0x30   :  { %v1108_v12 = vld [vmem:[%s1455_s6 + $0xb0] sm:$0xff]   ;;  %v1112_v17 = vld [vmem:[%s1455_s6 + $0xb8] sm:$0xff]   ;;  %v709_v45 = vld [vmem:[%s1457_s8 + $0x8] sm:$0xf] }
  0x31   :  { %vm1024_vm2 = vmpackc.low %vm794_vm0, %vm1141_vm1 }
  0x96   :  { %v56_v47 = vpop.permute.xlu0 %55 }
  0x97   :  { %v58_v48 = vmul.f32 %v56_v47, %v48_v46  ;;  %v1023_v46 = vpack.c.bf16 %v709_v45, %v708_v44  ;;  %v1140_v47 = vmov 0.0|0.0  }
  0x99   :  { %v59_v51 = vpack.c.bf16 %v58_v48, %v58_v48  ;;  %v1142_v48 = vmov 0.0  }
  0x9b   :  { %307 = vmatmul.mubr.bf16.vlgmr.msra.gmra.mrb[0].mxu0 %v59_v51  ;;  %348 = vmatmul.mubr.bf16.vlgmr.msra.gmra.mrb[0].mxu1 %v59_v51 }
  0x9c   :  { %962 = vmatpush3.bf16.msra.mxu0 %v1083_v49  ;;  %984 = vmatpush3.bf16.msra.mxu1 %v1084_v50  ;;  %v711_v49 = vld [vmem:[%s1458_s9] sm:$0x7] }
  0x9d   :  { %963 = vmatprep.subr.bf16.mxu0 %v1085_v52  ;;  %985 = vmatprep.subr.bf16.mxu1 %v1086_v53  ;;  %v710_v50 = vld [vmem:[%s1451_s2] sm:$0x3] }
  0x9e   :  { %v923_v53 = vld [vmem:[%s1456_s7] ss:$0 sm:$0xff]  ;;  %s1144_s7 = smov [#allocation3]  }
  0x9f   :  { %s883_s29 = sshll.u32 %s1144_s7, 4  ;;  %s884_s29 = int_to_ptr.vmem [resolvable:$true] %s883_s29 }
  0xa0   :  { %964 = vmatpush3.bf16.msra.mxu0 %v1087_v54  ;;  %986 = vmatpush3.bf16.msra.mxu1 %v1088_v55  ;;  %s1115_s30 = scalar_lea.vmem %s884_s29, 32  ;;  %p1120_p1 = scmp.lt.s32.totalorder %s884_s29, %s884_s29 }
  0xa1   :  { %965 = vmatprep.subr.bf16.mxu0 %v1089_v56  ;;  %987 = vmatprep.subr.bf16.mxu1 %v1090_v57  ;;  %p1116_p0 = scmp.ne.s32.totalorder %s884_s29, %s1115_s30  ;;  %p1121_p2 = scmp.lt.s32.totalorder %s1115_s30, %s1115_s30 }
  0xa3   :  { %p1122_p3 = por %p1121_p2, %p1120_p1 }
  0xa4   :  { %966 = vmatpush3.bf16.msra.mxu0 %v1091_v58  ;;  %988 = vmatpush3.bf16.msra.mxu1 %v1092_v59 }
  0xa5   :  { %967 = vmatprep.subr.bf16.mxu0 %v1093_v60  ;;  %989 = vmatprep.subr.bf16.mxu1 %v1094_v61  ;;  %p1123_p4 = pnand %p1122_p3, %p1116_p0 }
  0xa8   :  { %968 = vmatpush3.bf16.msra.mxu0 %v1095_v62  ;;  %990 = vmatpush3.bf16.msra.mxu1 %v1096_v63 }
  0xa9   :  { %969 = vmatprep.subr.bf16.mxu0 %v1097_v0  ;;  %991 = vmatprep.subr.bf16.mxu1 %v1098_v1 }
  0xac   :  { %970 = vmatpush3.bf16.msra.mxu0 %v1099_v2  ;;  %992 = vmatpush3.bf16.msra.mxu1 %v1100_v3 }
  0xad   :  { %971 = vmatprep.subr.bf16.mxu0 %v1101_v4  ;;  %993 = vmatprep.subr.bf16.mxu1 %v1102_v5  ;;  %v960_v4 = vld [vmem:[%s1459_s10] ss:$0 sm:$0xff] }
  0xb0   :  { %972 = vmatpush3.bf16.msra.mxu0 %v1103_v6  ;;  %994 = vmatpush3.bf16.msra.mxu1 %v1104_v7 }
  0xb1   :  { %973 = vmatprep.subr.bf16.mxu0 %v1105_v8  ;;  %995 = vmatprep.subr.bf16.mxu1 %v1106_v10 }
  0xb4   :  { %974 = vmatpush3.bf16.msra.mxu0 %v1107_v11  ;;  %996 = vmatpush3.bf16.msra.mxu1 %v1108_v12 }
  0xb5   :  { %975 = vmatprep.subr.bf16.mxu0 %v1109_v13  ;;  %997 = vmatprep.subr.bf16.mxu1 %v1110_v14 }
  0xb8   :  { %976 = vmatpush3.bf16.msra.mxu0 %v1111_v15  ;;  %998 = vmatpush3.bf16.msra.mxu1 %v1112_v17 }
  0xb9   :  { %1022 = vmatprep.subr.bf16.mxu1 %v1140_v47  ;;  %1010 = vmatprep.subr.mxu0 %v1142_v48 }
 0x16e   :  { %v308_v26 = vpop.f32.mrb[0].mxu0  ;;  %v349_v27 = vpop.f32.mrb[0].mxu1 }
 0x16f   :  { %v309_v28 = vadd.f32 %v308_v26, %v97_v22  ;;  %v350_v29 = vadd.f32 %v349_v27, %v105_v23  ;;  %v310_v30 = vpop.f32.mrb[1].mxu0  ;;  %v351_v31 = vpop.f32.mrb[1].mxu1 }
 0x170   :  { %v311_v32 = vadd.f32 %v310_v30, %v101_v24  ;;  %v352_v33 = vadd.f32 %v351_v31, %v109_v25  ;;  %v312_v34 = vpop.f32.mrb[2].mxu0  ;;  %v353_v35 = vpop.f32.mrb[2].mxu1 }
 0x171   :  { %v356_v36 = vmax.f32 %v309_v28, 0.0  ;;  %v358_v37 = vmax.f32 %v350_v29, 0.0  ;;  %v313_v38 = vpop.f32.mrb[3].mxu0  ;;  %v354_v39 = vpop.f32.mrb[3].mxu1 }
 0x172   :  { %v357_v40 = vmax.f32 %v311_v32, 0.0  ;;  %v359_v9 = vmax.f32 %v352_v33, 0.0 }
 0x173   :  { %v360_v42 = vpack.c.bf16 %v356_v36, %v356_v36  ;;  %v362_v43 = vpack.c.bf16 %v358_v37, %v358_v37 }
 0x174   :  { %v361_v16 = vpack.c.bf16 %v357_v40, %v357_v40  ;;  %v363_v41 = vpack.c.bf16 %v359_v9, %v359_v9 }
 0x176   :  { %659 = vmatprep.mubr.bf16.mxu0 %v361_v16  ;;  %699 = vmatprep.mubr.bf16.mxu1 %v363_v41 }
 0x177   :  { %660 = vmatmul.mubr.bf16.vlgmr.msra.gmra.mrb[4].mxu0 %v360_v42  ;;  %700 = vmatmul.mubr.bf16.vlgmr.msra.gmra.mrb[4].mxu1 %v362_v43 }
 0x178   :  { %1025 = vmatpush3.bf16.msk.msra.mxu1 %vm1024_vm2, %v1023_v46  ;;  %1011 = vmatpush3.msk.msra.mxu0 %vm716_vm3, %v711_v49 }
 0x179   :  { %1012 = vmatprep.mubr.msk.f32.mxu0 %vm1143_vm4, %v1142_v48  ;;  %1019 = vmatprep.mubr.msk.f32.mxu1 %vm1143_vm4, %v1142_v48 }
 0x17f   :  { %1013 = vmatmul.mubr.msk.f32.vlgmr.msra.gmra.mrb[8].mxu0 %vm712_vm5, %v710_v50 }
 0x24a   :  { %v977_v51 = vpop.f32.mrb[4].mxu0  ;;  %v999_v52 = vpop.f32.mrb[4].mxu1 }
 0x24b   :  { %v978_v54 = vpop.f32.mrb[5].mxu0  ;;  %v1000_v55 = vpop.f32.mrb[5].mxu1 }
 0x24c   :  { %v979_v56 = vadd.f32 %v978_v54, %v977_v51  ;;  %v1001_v57 = vadd.f32 %v1000_v55, %v999_v52  ;;  %v980_v58 = vpop.f32.mrb[6].mxu0  ;;  %v1002_v59 = vpop.f32.mrb[6].mxu1 }
 0x24d   :  { %v981_v60 = vpop.f32.mrb[7].mxu0  ;;  %v1003_v61 = vpop.f32.mrb[7].mxu1 }
 0x24e   :  { %v662_v62 = vadd.f32 %v979_v56, %v923_v53 }
 0x250   :  { %v702_v63 = vadd.f32 %v1001_v57, %v662_v62 }
 0x252   :  { %v707_v0 = vmax.f32 %v702_v63, 0.0  ;;  %v786_v1 = vpop.f32.mrb[8].mxu0 }
 0x253   :  { %v1014_v2 = vpop.f32.mrb[9].mxu0 }
 0x254   :  { %1020 = vmatmul.mubr.msk.f32.vlgmr.msra.gmra.mrb[8].mxu1 %vm790_vm6, %v707_v0 }
 0x327   :  { %v864_v3 = vpop.f32.mrb[8].mxu1 }
 0x328   :  { %v865_v5 = vadd.f32 %v864_v3, %v786_v1  ;;  %v1021_v6 = vpop.f32.mrb[9].mxu1 }
 0x32a   :  { %v875_v7 = vadd.f32 %v960_v4, %v865_v5 }
 0x32c   :  { %876 = vst [vmem:[#allocation3] sm:$0x3] %v875_v7 }
 0x32d   :  { %1126 = shalt.err (!%p1123_p4)
}
 0x32e   :  { %s1127_s14 = scalar_lea.hbm %s1460_s11, 32 }
 0x32f   :  { %p1128_p5 = scmp.ne.s32.totalorder %s1460_s11, %s1127_s14  ;;  %p1131_p6 = scmp.lt.u32.totalorder %s1127_s14, %s1460_s11 }
 0x331   :  { %p1133_p7 = pnand %p1131_p6, %p1128_p5 }
 0x333   :  { %1136 = shalt.err (!%p1133_p7)
}
 0x334   :  { %886 = dma.vmem_to_hbm [thread:$0]  %s884_s29, 32, %s1460_s11, [#allocation4]  }
 0x335   :  { %1137 = dma.done.wait [#allocation4], 32  }
 0x336   :  { %1138 = vsyncadd [#allocation4], 4294967264 }
 0x337   :  { %890 = vsyncpa [#allocation4], 1 }

</bundles_post_ra>
